<compile_context>
chip_gen: v5e
topology: v5e:2x2
jax: 0.10.0
libtpu: 0.0.40
codegen_flags: <defaults>
</compile_context>

<pallas_src>
import functools
import math

import jax
import jax.numpy as jnp
from jax import lax
from jax.experimental import pallas as pl
from jax.experimental.pallas import tpu as pltpu

EPS = 1e-5
LANE = 128


# ----------------------------------------------------------------------------
# Fused kernel: hoisted input projection + LSTM recurrence + folded-BN MLP
# ----------------------------------------------------------------------------
def _discriminator_kernel(x_ref,                 # (S*B, 2)  f32 traj_rel (time-major)
                          wx_ref, bx_ref,        # (2, 4H) bf16, (1, 4H) f32  (emb folded)
                          whh_ref,               # (H, 4H) bf16
                          wc1_ref, bc1_ref,      # (H, M) bf16, (1, M) f32    (BN folded)
                          wc2_ref, bc2_ref,      # (M, 128) bf16, (1, 128) f32 (BN folded, lane-padded)
                          scores_ref,            # (B, 128) f32 out (col 0 = score)
                          gx_scr,                # (S*B, 4H) f32 VMEM scratch
                          *, seq_len, batch):
    H = whh_ref.shape[0]
    B = batch

    # Hoisted input projection for ALL timesteps in one matmul (embedding,
    # LSTM input weights and both LSTM biases already folded into wx/bx).
    gx_scr[...] = (
        jnp.dot(x_ref[...].astype(jnp.bfloat16), wx_ref[...],
                preferred_element_type=jnp.float32)
        + bx_ref[...]
    )

    whh = whh_ref[...]          # resident bf16 (H, 4H)

    # LSTM recurrence (PyTorch gate order i, f, g, o); only h@whh is serial.
    def step(t, carry):
        h, c = carry
        row = pl.multiple_of(t * B, 8)
        gates = gx_scr[pl.ds(row, B), :] + jnp.dot(
            h.astype(jnp.bfloat16), whh, preferred_element_type=jnp.float32)
        i_g = jax.nn.sigmoid(gates[:, 0:H])
        f_g = jax.nn.sigmoid(gates[:, H:2 * H])
        g_g = jnp.tanh(gates[:, 2 * H:3 * H])
        o_g = jax.nn.sigmoid(gates[:, 3 * H:4 * H])
        c_new = f_g * c + i_g * g_g
        h_new = o_g * jnp.tanh(c_new)
        return h_new, c_new

    h0 = jnp.zeros((B, H), jnp.float32)
    c0 = jnp.zeros((B, H), jnp.float32)
    h, _ = lax.fori_loop(0, seq_len, step, (h0, c0), unroll=True)

    # real_classifier: (Linear+BN+ReLU) x2, BN folded, lane-dense final store.
    y = jnp.maximum(
        jnp.dot(h.astype(jnp.bfloat16), wc1_ref[...],
                preferred_element_type=jnp.float32) + bc1_ref[...],
        0.0,
    )
    scores_ref[...] = jnp.maximum(
        jnp.dot(y.astype(jnp.bfloat16), wc2_ref[...],
                preferred_element_type=jnp.float32) + bc2_ref[...],
        0.0,
    )


def trajectory_discriminator_forward(params, traj, traj_rel, seq_start_end=None):
    """d_type='local' forward: traj and seq_start_end are unused (API parity)."""
    del traj, seq_start_end
    S, B, _ = traj_rel.shape
    H = params["whh"].shape[0]
    M = params["wc1"].shape[1]

    # Pad batch to a multiple of 8 (f32 sublane); padded rows are sliced off.
    B_pad = ((B + 7) // 8) * 8
    if B_pad != B:
        traj_rel = jnp.pad(traj_rel, ((0, 0), (0, B_pad - B), (0, 0)))
    x_flat = traj_rel.reshape(S * B_pad, 2)     # time-major rows of B_pad

    vmem = pl.BlockSpec(memory_space=pltpu.MemorySpace.VMEM)
    scores_pad = pl.pallas_call(
        functools.partial(_discriminator_kernel, seq_len=S, batch=B_pad),
        out_shape=jax.ShapeDtypeStruct((B_pad, LANE), jnp.float32),
        in_specs=[vmem] * 8,
        out_specs=vmem,
        scratch_shapes=[pltpu.VMEM((S * B_pad, 4 * H), jnp.float32)],
    )(
        x_flat,
        params["wx"], params["bx"],
        params["whh"],
        params["wc1"], params["bc1"],
        params["wc2_pad"], params["bc2_pad"],
    )
    return scores_pad[:B, :1]


# ----------------------------------------------------------------------------
# Parameters (PyTorch-style uniform init) + folding (BN + embedding)
# ----------------------------------------------------------------------------
def init_raw_params(key, E, H, mlp_dim):
    ks = jax.random.split(key, 12)

    def U(k, shape, fan_in):
        bnd = 1.0 / math.sqrt(fan_in)
        return jax.random.uniform(k, shape, jnp.float32, -bnd, bnd)

    return {
        # Encoder.spatial_embedding: Linear(2, E)
        "emb_w": U(ks[0], (2, E), 2), "emb_b": U(ks[1], (1, E), 2),
        # Encoder.encoder: nn.LSTM(E, H, 1)
        "wih": U(ks[2], (E, 4 * H), H), "whh": U(ks[3], (H, 4 * H), H),
        "b_ih": U(ks[4], (1, 4 * H), H), "b_hh": U(ks[5], (1, 4 * H), H),
        # real_classifier: make_mlp([H, mlp_dim, 1])
        "wc1": U(ks[6], (H, mlp_dim), H), "bc1": U(ks[7], (1, mlp_dim), H),
        "g1": jnp.ones((1, mlp_dim), jnp.float32), "bt1": jnp.zeros((1, mlp_dim), jnp.float32),
        "m1": jnp.zeros((1, mlp_dim), jnp.float32), "v1": jnp.ones((1, mlp_dim), jnp.float32),
        "wc2": U(ks[8], (mlp_dim, 1), mlp_dim), "bc2": U(ks[9], (1, 1), mlp_dim),
        "g2": jnp.ones((1, 1), jnp.float32), "bt2": jnp.zeros((1, 1), jnp.float32),
        "m2": jnp.zeros((1, 1), jnp.float32), "v2": jnp.ones((1, 1), jnp.float32),
    }


def fold_params(raw):
    """Fold inference-mode BN into Linears, embedding into LSTM input weights,
    pad the final classifier column to 128 lanes, store matmul weights bf16."""
    def fold_bn(w, b, g, bt, m, v):
        scale = g / jnp.sqrt(v + EPS)
        return w * scale, (b - m) * scale + bt

    wc1, bc1 = fold_bn(raw["wc1"], raw["bc1"], raw["g1"], raw["bt1"], raw["m1"], raw["v1"])
    wc2, bc2 = fold_bn(raw["wc2"], raw["bc2"], raw["g2"], raw["bt2"], raw["m2"], raw["v2"])

    # Exact embedding fold (no nonlinearity between embedding and LSTM input).
    wx = raw["emb_w"] @ raw["wih"]                              # (2, 4H)
    bx = raw["emb_b"] @ raw["wih"] + raw["b_ih"] + raw["b_hh"]  # (1, 4H)

    M = wc2.shape[0]
    wc2_pad = jnp.zeros((M, LANE), jnp.float32).at[:, :1].set(wc2)
    bc2_pad = jnp.zeros((1, LANE), jnp.float32).at[:, :1].set(bc2)

    return {
        "wx": wx.astype(jnp.bfloat16), "bx": bx,
        "whh": raw["whh"].astype(jnp.bfloat16),
        "wc1": wc1.astype(jnp.bfloat16), "bc1": bc1,
        "wc2_pad": wc2_pad.astype(jnp.bfloat16), "bc2_pad": bc2_pad,
    }


# ----------------------------------------------------------------------------
# Pure-JAX f32 reference (unfolded params, explicit BN) for correctness
# ----------------------------------------------------------------------------
def reference_forward(raw, traj_rel):
    seq_len, B, _ = traj_rel.shape
    E = raw["emb_w"].shape[1]
    H = raw["whh"].shape[0]

    emb = (traj_rel.reshape(-1, 2) @ raw["emb_w"] + raw["emb_b"]).reshape(seq_len, B, E)
    h = jnp.zeros((B, H), jnp.float32)
    c = jnp.zeros((B, H), jnp.float32)
    for t in range(seq_len):
        gates = emb[t] @ raw["wih"] + h @ raw["whh"] + raw["b_ih"] + raw["b_hh"]
        i = jax.nn.sigmoid(gates[:, 0:H])
        f = jax.nn.sigmoid(gates[:, H:2 * H])
        g = jnp.tanh(gates[:, 2 * H:3 * H])
        o = jax.nn.sigmoid(gates[:, 3 * H:4 * H])
        c = f * c + i * g
        h = o * jnp.tanh(c)

    def bn(x, g_, bt_, m_, v_):
        return (x - m_) * (g_ / jnp.sqrt(v_ + EPS)) + bt_

    y = jnp.maximum(bn(h @ raw["wc1"] + raw["bc1"],
                       raw["g1"], raw["bt1"], raw["m1"], raw["v1"]), 0.0)
    s = jnp.maximum(bn(y @ raw["wc2"] + raw["bc2"],
                       raw["g2"], raw["bt2"], raw["m2"], raw["v2"]), 0.0)
    return s


if __name__ == "__main__":
    # Small shapes consistent with the module: H=128 keeps each LSTM gate a
    # full 128-lane tile; B=8 keeps rows sublane-aligned for f32.
    E, H, MLP_DIM = 64, 128, 128
    OBS_LEN, PRED_LEN = 4, 4
    SEQ_LEN = OBS_LEN + PRED_LEN
    B = 8

    key = jax.random.PRNGKey(0)
    kp, kt, kr = jax.random.split(key, 3)
    raw = init_raw_params(kp, E, H, MLP_DIM)
    params = fold_params(raw)

    traj = jax.random.normal(kt, (SEQ_LEN, B, 2), jnp.float32)       # unused (d_type='local')
    traj_rel = 0.1 * jax.random.normal(kr, (SEQ_LEN, B, 2), jnp.float32)

    scores = trajectory_discriminator_forward(params, traj, traj_rel)
    jax.block_until_ready(scores)

    ref = reference_forward(raw, traj_rel)
    assert scores.shape == (B, 1)
    assert bool(jnp.all(jnp.isfinite(scores)))
    # bf16 matmul operands (f32 accumulate) vs f32 reference -> loosened tolerance.
    assert bool(jnp.allclose(scores, ref, rtol=5e-2, atol=1e-2)), (
        f"max abs err {float(jnp.max(jnp.abs(scores - ref)))}")
    print("KERNEL_OK")
</pallas_src>

<mosaic_0001>
module attributes {stable_mosaic.version = 11 : i64} {
  func.func @_discriminator_kernel(%arg0: memref<64x2xf32, #tpu.memory_space<vmem>>, %arg1: memref<2x512xbf16, #tpu.memory_space<vmem>>, %arg2: memref<1x512xf32, #tpu.memory_space<vmem>>, %arg3: memref<128x512xbf16, #tpu.memory_space<vmem>>, %arg4: memref<128x128xbf16, #tpu.memory_space<vmem>>, %arg5: memref<1x128xf32, #tpu.memory_space<vmem>>, %arg6: memref<128x128xbf16, #tpu.memory_space<vmem>>, %arg7: memref<1x128xf32, #tpu.memory_space<vmem>>, %arg8: memref<8x128xf32, #tpu.memory_space<vmem>>, %arg9: memref<64x512xf32, #tpu.memory_space<vmem>>) attributes {dimension_semantics = [], scalar_prefetch = 0 : i64, scratch_operands = 1 : i64, tpu.core_type = #tpu.core_type<tc>} {
    %c0 = arith.constant 0 : index
    %c0_0 = arith.constant 0 : index
    %0 = vector.load %arg0[%c0, %c0_0] : memref<64x2xf32, #tpu.memory_space<vmem>>, vector<64x2xf32>
    %1 = arith.truncf %0 : vector<64x2xf32> to vector<64x2xbf16>
    %c0_1 = arith.constant 0 : index
    %c0_2 = arith.constant 0 : index
    %2 = vector.load %arg1[%c0_1, %c0_2] : memref<2x512xbf16, #tpu.memory_space<vmem>>, vector<2x512xbf16>
    %cst = arith.constant dense<0.000000e+00> : vector<64x512xf32>
    %3 = tpu.matmul %1, %2, %cst {dimension_numbers = #tpu.dot_dimension_numbers<[1], [0], [0], [1], [0, 0, 1, 1], [], []>} : vector<64x2xbf16>, vector<2x512xbf16>, vector<64x512xf32> -> vector<64x512xf32>
    %c0_3 = arith.constant 0 : index
    %c0_4 = arith.constant 0 : index
    %4 = vector.load %arg2[%c0_3, %c0_4] : memref<1x512xf32, #tpu.memory_space<vmem>>, vector<1x512xf32>
    %5 = vector.broadcast %4 : vector<1x512xf32> to vector<64x512xf32>
    %6 = arith.addf %3, %5 : vector<64x512xf32>
    %c0_5 = arith.constant 0 : index
    %c0_6 = arith.constant 0 : index
    %7 = vector.load %arg9[%c0_5, %c0_6] : memref<64x512xf32, #tpu.memory_space<vmem>>, vector<64x512xf32>
    tpu.vector_store %arg9[%c0_5, %c0_6], %6 {strides = array<i32>} : memref<64x512xf32, #tpu.memory_space<vmem>>, vector<64x512xf32>,
    %c0_7 = arith.constant 0 : index
    %c0_8 = arith.constant 0 : index
    %8 = vector.load %arg3[%c0_7, %c0_8] : memref<128x512xbf16, #tpu.memory_space<vmem>>, vector<128x512xbf16>
    %cst_9 = arith.constant 0.000000e+00 : f32
    %9 = vector.broadcast %cst_9 : f32 to vector<8x128xf32>
    %cst_10 = arith.constant 0.000000e+00 : f32
    %10 = vector.broadcast %cst_10 : f32 to vector<8x128xf32>
    %c0_i32 = arith.constant 0 : i32
    %c8_i32 = arith.constant 8 : i32
    %11 = arith.muli %c0_i32, %c8_i32 : i32
    %12 = tpu.assume_multiple %11, 8 : i32
    %13 = arith.index_cast %12 : i32 to index
    %c0_11 = arith.constant 0 : index
    %14 = vector.load %arg9[%13, %c0_11] : memref<64x512xf32, #tpu.memory_space<vmem>>, vector<8x512xf32>
    %15 = arith.truncf %9 : vector<8x128xf32> to vector<8x128xbf16>
    %cst_12 = arith.constant dense<0.000000e+00> : vector<8x512xf32>
    %16 = tpu.matmul %15, %8, %cst_12 {dimension_numbers = #tpu.dot_dimension_numbers<[1], [0], [0], [1], [0, 0, 1, 1], [], []>} : vector<8x128xbf16>, vector<128x512xbf16>, vector<8x512xf32> -> vector<8x512xf32>
    %17 = arith.addf %14, %16 : vector<8x512xf32>
    %18 = vector.extract_strided_slice %17 {offsets = [0, 0], sizes = [8, 128], strides = [1, 1]} : vector<8x512xf32> to vector<8x128xf32>
    %19 = arith.negf %18 : vector<8x128xf32>
    %20 = math.exp %19 : vector<8x128xf32>
    %cst_13 = arith.constant 1.000000e+00 : f32
    %21 = vector.broadcast %cst_13 : f32 to vector<8x128xf32>
    %22 = arith.addf %21, %20 : vector<8x128xf32>
    %23 = arith.divf %21, %22 : vector<8x128xf32>
    %24 = vector.extract_strided_slice %17 {offsets = [0, 128], sizes = [8, 128], strides = [1, 1]} : vector<8x512xf32> to vector<8x128xf32>
    %25 = arith.negf %24 : vector<8x128xf32>
    %26 = math.exp %25 : vector<8x128xf32>
    %cst_14 = arith.constant 1.000000e+00 : f32
    %27 = vector.broadcast %cst_14 : f32 to vector<8x128xf32>
    %28 = arith.addf %27, %26 : vector<8x128xf32>
    %29 = arith.divf %27, %28 : vector<8x128xf32>
    %30 = vector.extract_strided_slice %17 {offsets = [0, 256], sizes = [8, 128], strides = [1, 1]} : vector<8x512xf32> to vector<8x128xf32>
    %31 = math.tanh %30 : vector<8x128xf32>
    %32 = vector.extract_strided_slice %17 {offsets = [0, 384], sizes = [8, 128], strides = [1, 1]} : vector<8x512xf32> to vector<8x128xf32>
    %33 = arith.negf %32 : vector<8x128xf32>
    %34 = math.exp %33 : vector<8x128xf32>
    %cst_15 = arith.constant 1.000000e+00 : f32
    %35 = vector.broadcast %cst_15 : f32 to vector<8x128xf32>
    %36 = arith.addf %35, %34 : vector<8x128xf32>
    %37 = arith.divf %35, %36 : vector<8x128xf32>
    %38 = arith.mulf %29, %10 : vector<8x128xf32>
    %39 = arith.mulf %23, %31 : vector<8x128xf32>
    %40 = arith.addf %38, %39 : vector<8x128xf32>
    %41 = math.tanh %40 : vector<8x128xf32>
    %42 = arith.mulf %37, %41 : vector<8x128xf32>
    %c1_i32 = arith.constant 1 : i32
    %c8_i32_16 = arith.constant 8 : i32
    %43 = arith.muli %c1_i32, %c8_i32_16 : i32
    %44 = tpu.assume_multiple %43, 8 : i32
    %45 = arith.index_cast %44 : i32 to index
    %c0_17 = arith.constant 0 : index
    %46 = vector.load %arg9[%45, %c0_17] : memref<64x512xf32, #tpu.memory_space<vmem>>, vector<8x512xf32>
    %47 = arith.truncf %42 : vector<8x128xf32> to vector<8x128xbf16>
    %cst_18 = arith.constant dense<0.000000e+00> : vector<8x512xf32>
    %48 = tpu.matmul %47, %8, %cst_18 {dimension_numbers = #tpu.dot_dimension_numbers<[1], [0], [0], [1], [0, 0, 1, 1], [], []>} : vector<8x128xbf16>, vector<128x512xbf16>, vector<8x512xf32> -> vector<8x512xf32>
    %49 = arith.addf %46, %48 : vector<8x512xf32>
    %50 = vector.extract_strided_slice %49 {offsets = [0, 0], sizes = [8, 128], strides = [1, 1]} : vector<8x512xf32> to vector<8x128xf32>
    %51 = arith.negf %50 : vector<8x128xf32>
    %52 = math.exp %51 : vector<8x128xf32>
    %cst_19 = arith.constant 1.000000e+00 : f32
    %53 = vector.broadcast %cst_19 : f32 to vector<8x128xf32>
    %54 = arith.addf %53, %52 : vector<8x128xf32>
    %55 = arith.divf %53, %54 : vector<8x128xf32>
    %56 = vector.extract_strided_slice %49 {offsets = [0, 128], sizes = [8, 128], strides = [1, 1]} : vector<8x512xf32> to vector<8x128xf32>
    %57 = arith.negf %56 : vector<8x128xf32>
    %58 = math.exp %57 : vector<8x128xf32>
    %cst_20 = arith.constant 1.000000e+00 : f32
    %59 = vector.broadcast %cst_20 : f32 to vector<8x128xf32>
    %60 = arith.addf %59, %58 : vector<8x128xf32>
    %61 = arith.divf %59, %60 : vector<8x128xf32>
    %62 = vector.extract_strided_slice %49 {offsets = [0, 256], sizes = [8, 128], strides = [1, 1]} : vector<8x512xf32> to vector<8x128xf32>
    %63 = math.tanh %62 : vector<8x128xf32>
    %64 = vector.extract_strided_slice %49 {offsets = [0, 384], sizes = [8, 128], strides = [1, 1]} : vector<8x512xf32> to vector<8x128xf32>
    %65 = arith.negf %64 : vector<8x128xf32>
    %66 = math.exp %65 : vector<8x128xf32>
    %cst_21 = arith.constant 1.000000e+00 : f32
    %67 = vector.broadcast %cst_21 : f32 to vector<8x128xf32>
    %68 = arith.addf %67, %66 : vector<8x128xf32>
    %69 = arith.divf %67, %68 : vector<8x128xf32>
    %70 = arith.mulf %61, %40 : vector<8x128xf32>
    %71 = arith.mulf %55, %63 : vector<8x128xf32>
    %72 = arith.addf %70, %71 : vector<8x128xf32>
    %73 = math.tanh %72 : vector<8x128xf32>
    %74 = arith.mulf %69, %73 : vector<8x128xf32>
    %c2_i32 = arith.constant 2 : i32
    %c8_i32_22 = arith.constant 8 : i32
    %75 = arith.muli %c2_i32, %c8_i32_22 : i32
    %76 = tpu.assume_multiple %75, 8 : i32
    %77 = arith.index_cast %76 : i32 to index
    %c0_23 = arith.constant 0 : index
    %78 = vector.load %arg9[%77, %c0_23] : memref<64x512xf32, #tpu.memory_space<vmem>>, vector<8x512xf32>
    %79 = arith.truncf %74 : vector<8x128xf32> to vector<8x128xbf16>
    %cst_24 = arith.constant dense<0.000000e+00> : vector<8x512xf32>
    %80 = tpu.matmul %79, %8, %cst_24 {dimension_numbers = #tpu.dot_dimension_numbers<[1], [0], [0], [1], [0, 0, 1, 1], [], []>} : vector<8x128xbf16>, vector<128x512xbf16>, vector<8x512xf32> -> vector<8x512xf32>
    %81 = arith.addf %78, %80 : vector<8x512xf32>
    %82 = vector.extract_strided_slice %81 {offsets = [0, 0], sizes = [8, 128], strides = [1, 1]} : vector<8x512xf32> to vector<8x128xf32>
    %83 = arith.negf %82 : vector<8x128xf32>
    %84 = math.exp %83 : vector<8x128xf32>
    %cst_25 = arith.constant 1.000000e+00 : f32
    %85 = vector.broadcast %cst_25 : f32 to vector<8x128xf32>
    %86 = arith.addf %85, %84 : vector<8x128xf32>
    %87 = arith.divf %85, %86 : vector<8x128xf32>
    %88 = vector.extract_strided_slice %81 {offsets = [0, 128], sizes = [8, 128], strides = [1, 1]} : vector<8x512xf32> to vector<8x128xf32>
    %89 = arith.negf %88 : vector<8x128xf32>
    %90 = math.exp %89 : vector<8x128xf32>
    %cst_26 = arith.constant 1.000000e+00 : f32
    %91 = vector.broadcast %cst_26 : f32 to vector<8x128xf32>
    %92 = arith.addf %91, %90 : vector<8x128xf32>
    %93 = arith.divf %91, %92 : vector<8x128xf32>
    %94 = vector.extract_strided_slice %81 {offsets = [0, 256], sizes = [8, 128], strides = [1, 1]} : vector<8x512xf32> to vector<8x128xf32>
    %95 = math.tanh %94 : vector<8x128xf32>
    %96 = vector.extract_strided_slice %81 {offsets = [0, 384], sizes = [8, 128], strides = [1, 1]} : vector<8x512xf32> to vector<8x128xf32>
    %97 = arith.negf %96 : vector<8x128xf32>
    %98 = math.exp %97 : vector<8x128xf32>
    %cst_27 = arith.constant 1.000000e+00 : f32
    %99 = vector.broadcast %cst_27 : f32 to vector<8x128xf32>
    %100 = arith.addf %99, %98 : vector<8x128xf32>
    %101 = arith.divf %99, %100 : vector<8x128xf32>
    %102 = arith.mulf %93, %72 : vector<8x128xf32>
    %103 = arith.mulf %87, %95 : vector<8x128xf32>
    %104 = arith.addf %102, %103 : vector<8x128xf32>
    %105 = math.tanh %104 : vector<8x128xf32>
    %106 = arith.mulf %101, %105 : vector<8x128xf32>
    %c3_i32 = arith.constant 3 : i32
    %c8_i32_28 = arith.constant 8 : i32
    %107 = arith.muli %c3_i32, %c8_i32_28 : i32
    %108 = tpu.assume_multiple %107, 8 : i32
    %109 = arith.index_cast %108 : i32 to index
    %c0_29 = arith.constant 0 : index
    %110 = vector.load %arg9[%109, %c0_29] : memref<64x512xf32, #tpu.memory_space<vmem>>, vector<8x512xf32>
    %111 = arith.truncf %106 : vector<8x128xf32> to vector<8x128xbf16>
    %cst_30 = arith.constant dense<0.000000e+00> : vector<8x512xf32>
    %112 = tpu.matmul %111, %8, %cst_30 {dimension_numbers = #tpu.dot_dimension_numbers<[1], [0], [0], [1], [0, 0, 1, 1], [], []>} : vector<8x128xbf16>, vector<128x512xbf16>, vector<8x512xf32> -> vector<8x512xf32>
    %113 = arith.addf %110, %112 : vector<8x512xf32>
    %114 = vector.extract_strided_slice %113 {offsets = [0, 0], sizes = [8, 128], strides = [1, 1]} : vector<8x512xf32> to vector<8x128xf32>
    %115 = arith.negf %114 : vector<8x128xf32>
    %116 = math.exp %115 : vector<8x128xf32>
    %cst_31 = arith.constant 1.000000e+00 : f32
    %117 = vector.broadcast %cst_31 : f32 to vector<8x128xf32>
    %118 = arith.addf %117, %116 : vector<8x128xf32>
    %119 = arith.divf %117, %118 : vector<8x128xf32>
    %120 = vector.extract_strided_slice %113 {offsets = [0, 128], sizes = [8, 128], strides = [1, 1]} : vector<8x512xf32> to vector<8x128xf32>
    %121 = arith.negf %120 : vector<8x128xf32>
    %122 = math.exp %121 : vector<8x128xf32>
    %cst_32 = arith.constant 1.000000e+00 : f32
    %123 = vector.broadcast %cst_32 : f32 to vector<8x128xf32>
    %124 = arith.addf %123, %122 : vector<8x128xf32>
    %125 = arith.divf %123, %124 : vector<8x128xf32>
    %126 = vector.extract_strided_slice %113 {offsets = [0, 256], sizes = [8, 128], strides = [1, 1]} : vector<8x512xf32> to vector<8x128xf32>
    %127 = math.tanh %126 : vector<8x128xf32>
    %128 = vector.extract_strided_slice %113 {offsets = [0, 384], sizes = [8, 128], strides = [1, 1]} : vector<8x512xf32> to vector<8x128xf32>
    %129 = arith.negf %128 : vector<8x128xf32>
    %130 = math.exp %129 : vector<8x128xf32>
    %cst_33 = arith.constant 1.000000e+00 : f32
    %131 = vector.broadcast %cst_33 : f32 to vector<8x128xf32>
    %132 = arith.addf %131, %130 : vector<8x128xf32>
    %133 = arith.divf %131, %132 : vector<8x128xf32>
    %134 = arith.mulf %125, %104 : vector<8x128xf32>
    %135 = arith.mulf %119, %127 : vector<8x128xf32>
    %136 = arith.addf %134, %135 : vector<8x128xf32>
    %137 = math.tanh %136 : vector<8x128xf32>
    %138 = arith.mulf %133, %137 : vector<8x128xf32>
    %c4_i32 = arith.constant 4 : i32
    %c8_i32_34 = arith.constant 8 : i32
    %139 = arith.muli %c4_i32, %c8_i32_34 : i32
    %140 = tpu.assume_multiple %139, 8 : i32
    %141 = arith.index_cast %140 : i32 to index
    %c0_35 = arith.constant 0 : index
    %142 = vector.load %arg9[%141, %c0_35] : memref<64x512xf32, #tpu.memory_space<vmem>>, vector<8x512xf32>
    %143 = arith.truncf %138 : vector<8x128xf32> to vector<8x128xbf16>
    %cst_36 = arith.constant dense<0.000000e+00> : vector<8x512xf32>
    %144 = tpu.matmul %143, %8, %cst_36 {dimension_numbers = #tpu.dot_dimension_numbers<[1], [0], [0], [1], [0, 0, 1, 1], [], []>} : vector<8x128xbf16>, vector<128x512xbf16>, vector<8x512xf32> -> vector<8x512xf32>
    %145 = arith.addf %142, %144 : vector<8x512xf32>
    %146 = vector.extract_strided_slice %145 {offsets = [0, 0], sizes = [8, 128], strides = [1, 1]} : vector<8x512xf32> to vector<8x128xf32>
    %147 = arith.negf %146 : vector<8x128xf32>
    %148 = math.exp %147 : vector<8x128xf32>
    %cst_37 = arith.constant 1.000000e+00 : f32
    %149 = vector.broadcast %cst_37 : f32 to vector<8x128xf32>
    %150 = arith.addf %149, %148 : vector<8x128xf32>
    %151 = arith.divf %149, %150 : vector<8x128xf32>
    %152 = vector.extract_strided_slice %145 {offsets = [0, 128], sizes = [8, 128], strides = [1, 1]} : vector<8x512xf32> to vector<8x128xf32>
    %153 = arith.negf %152 : vector<8x128xf32>
    %154 = math.exp %153 : vector<8x128xf32>
    %cst_38 = arith.constant 1.000000e+00 : f32
    %155 = vector.broadcast %cst_38 : f32 to vector<8x128xf32>
    %156 = arith.addf %155, %154 : vector<8x128xf32>
    %157 = arith.divf %155, %156 : vector<8x128xf32>
    %158 = vector.extract_strided_slice %145 {offsets = [0, 256], sizes = [8, 128], strides = [1, 1]} : vector<8x512xf32> to vector<8x128xf32>
    %159 = math.tanh %158 : vector<8x128xf32>
    %160 = vector.extract_strided_slice %145 {offsets = [0, 384], sizes = [8, 128], strides = [1, 1]} : vector<8x512xf32> to vector<8x128xf32>
    %161 = arith.negf %160 : vector<8x128xf32>
    %162 = math.exp %161 : vector<8x128xf32>
    %cst_39 = arith.constant 1.000000e+00 : f32
    %163 = vector.broadcast %cst_39 : f32 to vector<8x128xf32>
    %164 = arith.addf %163, %162 : vector<8x128xf32>
    %165 = arith.divf %163, %164 : vector<8x128xf32>
    %166 = arith.mulf %157, %136 : vector<8x128xf32>
    %167 = arith.mulf %151, %159 : vector<8x128xf32>
    %168 = arith.addf %166, %167 : vector<8x128xf32>
    %169 = math.tanh %168 : vector<8x128xf32>
    %170 = arith.mulf %165, %169 : vector<8x128xf32>
    %c5_i32 = arith.constant 5 : i32
    %c8_i32_40 = arith.constant 8 : i32
    %171 = arith.muli %c5_i32, %c8_i32_40 : i32
    %172 = tpu.assume_multiple %171, 8 : i32
    %173 = arith.index_cast %172 : i32 to index
    %c0_41 = arith.constant 0 : index
    %174 = vector.load %arg9[%173, %c0_41] : memref<64x512xf32, #tpu.memory_space<vmem>>, vector<8x512xf32>
    %175 = arith.truncf %170 : vector<8x128xf32> to vector<8x128xbf16>
    %cst_42 = arith.constant dense<0.000000e+00> : vector<8x512xf32>
    %176 = tpu.matmul %175, %8, %cst_42 {dimension_numbers = #tpu.dot_dimension_numbers<[1], [0], [0], [1], [0, 0, 1, 1], [], []>} : vector<8x128xbf16>, vector<128x512xbf16>, vector<8x512xf32> -> vector<8x512xf32>
    %177 = arith.addf %174, %176 : vector<8x512xf32>
    %178 = vector.extract_strided_slice %177 {offsets = [0, 0], sizes = [8, 128], strides = [1, 1]} : vector<8x512xf32> to vector<8x128xf32>
    %179 = arith.negf %178 : vector<8x128xf32>
    %180 = math.exp %179 : vector<8x128xf32>
    %cst_43 = arith.constant 1.000000e+00 : f32
    %181 = vector.broadcast %cst_43 : f32 to vector<8x128xf32>
    %182 = arith.addf %181, %180 : vector<8x128xf32>
    %183 = arith.divf %181, %182 : vector<8x128xf32>
    %184 = vector.extract_strided_slice %177 {offsets = [0, 128], sizes = [8, 128], strides = [1, 1]} : vector<8x512xf32> to vector<8x128xf32>
    %185 = arith.negf %184 : vector<8x128xf32>
    %186 = math.exp %185 : vector<8x128xf32>
    %cst_44 = arith.constant 1.000000e+00 : f32
    %187 = vector.broadcast %cst_44 : f32 to vector<8x128xf32>
    %188 = arith.addf %187, %186 : vector<8x128xf32>
    %189 = arith.divf %187, %188 : vector<8x128xf32>
    %190 = vector.extract_strided_slice %177 {offsets = [0, 256], sizes = [8, 128], strides = [1, 1]} : vector<8x512xf32> to vector<8x128xf32>
    %191 = math.tanh %190 : vector<8x128xf32>
    %192 = vector.extract_strided_slice %177 {offsets = [0, 384], sizes = [8, 128], strides = [1, 1]} : vector<8x512xf32> to vector<8x128xf32>
    %193 = arith.negf %192 : vector<8x128xf32>
    %194 = math.exp %193 : vector<8x128xf32>
    %cst_45 = arith.constant 1.000000e+00 : f32
    %195 = vector.broadcast %cst_45 : f32 to vector<8x128xf32>
    %196 = arith.addf %195, %194 : vector<8x128xf32>
    %197 = arith.divf %195, %196 : vector<8x128xf32>
    %198 = arith.mulf %189, %168 : vector<8x128xf32>
    %199 = arith.mulf %183, %191 : vector<8x128xf32>
    %200 = arith.addf %198, %199 : vector<8x128xf32>
    %201 = math.tanh %200 : vector<8x128xf32>
    %202 = arith.mulf %197, %201 : vector<8x128xf32>
    %c6_i32 = arith.constant 6 : i32
    %c8_i32_46 = arith.constant 8 : i32
    %203 = arith.muli %c6_i32, %c8_i32_46 : i32
    %204 = tpu.assume_multiple %203, 8 : i32
    %205 = arith.index_cast %204 : i32 to index
    %c0_47 = arith.constant 0 : index
    %206 = vector.load %arg9[%205, %c0_47] : memref<64x512xf32, #tpu.memory_space<vmem>>, vector<8x512xf32>
    %207 = arith.truncf %202 : vector<8x128xf32> to vector<8x128xbf16>
    %cst_48 = arith.constant dense<0.000000e+00> : vector<8x512xf32>
    %208 = tpu.matmul %207, %8, %cst_48 {dimension_numbers = #tpu.dot_dimension_numbers<[1], [0], [0], [1], [0, 0, 1, 1], [], []>} : vector<8x128xbf16>, vector<128x512xbf16>, vector<8x512xf32> -> vector<8x512xf32>
    %209 = arith.addf %206, %208 : vector<8x512xf32>
    %210 = vector.extract_strided_slice %209 {offsets = [0, 0], sizes = [8, 128], strides = [1, 1]} : vector<8x512xf32> to vector<8x128xf32>
    %211 = arith.negf %210 : vector<8x128xf32>
    %212 = math.exp %211 : vector<8x128xf32>
    %cst_49 = arith.constant 1.000000e+00 : f32
    %213 = vector.broadcast %cst_49 : f32 to vector<8x128xf32>
    %214 = arith.addf %213, %212 : vector<8x128xf32>
    %215 = arith.divf %213, %214 : vector<8x128xf32>
    %216 = vector.extract_strided_slice %209 {offsets = [0, 128], sizes = [8, 128], strides = [1, 1]} : vector<8x512xf32> to vector<8x128xf32>
    %217 = arith.negf %216 : vector<8x128xf32>
    %218 = math.exp %217 : vector<8x128xf32>
    %cst_50 = arith.constant 1.000000e+00 : f32
    %219 = vector.broadcast %cst_50 : f32 to vector<8x128xf32>
    %220 = arith.addf %219, %218 : vector<8x128xf32>
    %221 = arith.divf %219, %220 : vector<8x128xf32>
    %222 = vector.extract_strided_slice %209 {offsets = [0, 256], sizes = [8, 128], strides = [1, 1]} : vector<8x512xf32> to vector<8x128xf32>
    %223 = math.tanh %222 : vector<8x128xf32>
    %224 = vector.extract_strided_slice %209 {offsets = [0, 384], sizes = [8, 128], strides = [1, 1]} : vector<8x512xf32> to vector<8x128xf32>
    %225 = arith.negf %224 : vector<8x128xf32>
    %226 = math.exp %225 : vector<8x128xf32>
    %cst_51 = arith.constant 1.000000e+00 : f32
    %227 = vector.broadcast %cst_51 : f32 to vector<8x128xf32>
    %228 = arith.addf %227, %226 : vector<8x128xf32>
    %229 = arith.divf %227, %228 : vector<8x128xf32>
    %230 = arith.mulf %221, %200 : vector<8x128xf32>
    %231 = arith.mulf %215, %223 : vector<8x128xf32>
    %232 = arith.addf %230, %231 : vector<8x128xf32>
    %233 = math.tanh %232 : vector<8x128xf32>
    %234 = arith.mulf %229, %233 : vector<8x128xf32>
    %c7_i32 = arith.constant 7 : i32
    %c8_i32_52 = arith.constant 8 : i32
    %235 = arith.muli %c7_i32, %c8_i32_52 : i32
    %236 = tpu.assume_multiple %235, 8 : i32
    %237 = arith.index_cast %236 : i32 to index
    %c0_53 = arith.constant 0 : index
    %238 = vector.load %arg9[%237, %c0_53] : memref<64x512xf32, #tpu.memory_space<vmem>>, vector<8x512xf32>
    %239 = arith.truncf %234 : vector<8x128xf32> to vector<8x128xbf16>
    %cst_54 = arith.constant dense<0.000000e+00> : vector<8x512xf32>
    %240 = tpu.matmul %239, %8, %cst_54 {dimension_numbers = #tpu.dot_dimension_numbers<[1], [0], [0], [1], [0, 0, 1, 1], [], []>} : vector<8x128xbf16>, vector<128x512xbf16>, vector<8x512xf32> -> vector<8x512xf32>
    %241 = arith.addf %238, %240 : vector<8x512xf32>
    %242 = vector.extract_strided_slice %241 {offsets = [0, 0], sizes = [8, 128], strides = [1, 1]} : vector<8x512xf32> to vector<8x128xf32>
    %243 = arith.negf %242 : vector<8x128xf32>
    %244 = math.exp %243 : vector<8x128xf32>
    %cst_55 = arith.constant 1.000000e+00 : f32
    %245 = vector.broadcast %cst_55 : f32 to vector<8x128xf32>
    %246 = arith.addf %245, %244 : vector<8x128xf32>
    %247 = arith.divf %245, %246 : vector<8x128xf32>
    %248 = vector.extract_strided_slice %241 {offsets = [0, 128], sizes = [8, 128], strides = [1, 1]} : vector<8x512xf32> to vector<8x128xf32>
    %249 = arith.negf %248 : vector<8x128xf32>
    %250 = math.exp %249 : vector<8x128xf32>
    %cst_56 = arith.constant 1.000000e+00 : f32
    %251 = vector.broadcast %cst_56 : f32 to vector<8x128xf32>
    %252 = arith.addf %251, %250 : vector<8x128xf32>
    %253 = arith.divf %251, %252 : vector<8x128xf32>
    %254 = vector.extract_strided_slice %241 {offsets = [0, 256], sizes = [8, 128], strides = [1, 1]} : vector<8x512xf32> to vector<8x128xf32>
    %255 = math.tanh %254 : vector<8x128xf32>
    %256 = vector.extract_strided_slice %241 {offsets = [0, 384], sizes = [8, 128], strides = [1, 1]} : vector<8x512xf32> to vector<8x128xf32>
    %257 = arith.negf %256 : vector<8x128xf32>
    %258 = math.exp %257 : vector<8x128xf32>
    %cst_57 = arith.constant 1.000000e+00 : f32
    %259 = vector.broadcast %cst_57 : f32 to vector<8x128xf32>
    %260 = arith.addf %259, %258 : vector<8x128xf32>
    %261 = arith.divf %259, %260 : vector<8x128xf32>
    %262 = arith.mulf %253, %232 : vector<8x128xf32>
    %263 = arith.mulf %247, %255 : vector<8x128xf32>
    %264 = arith.addf %262, %263 : vector<8x128xf32>
    %265 = math.tanh %264 : vector<8x128xf32>
    %266 = arith.mulf %261, %265 : vector<8x128xf32>
    %c8_i32_58 = arith.constant 8 : i32
    %267 = arith.truncf %266 : vector<8x128xf32> to vector<8x128xbf16>
    %c0_59 = arith.constant 0 : index
    %c0_60 = arith.constant 0 : index
    %268 = vector.load %arg4[%c0_59, %c0_60] : memref<128x128xbf16, #tpu.memory_space<vmem>>, vector<128x128xbf16>
    %cst_61 = arith.constant dense<0.000000e+00> : vector<8x128xf32>
    %269 = tpu.matmul %267, %268, %cst_61 {dimension_numbers = #tpu.dot_dimension_numbers<[1], [0], [0], [1], [0, 0, 1, 1], [], []>} : vector<8x128xbf16>, vector<128x128xbf16>, vector<8x128xf32> -> vector<8x128xf32>
    %c0_62 = arith.constant 0 : index
    %c0_63 = arith.constant 0 : index
    %270 = vector.load %arg5[%c0_62, %c0_63] : memref<1x128xf32, #tpu.memory_space<vmem>>, vector<1x128xf32>
    %271 = vector.broadcast %270 : vector<1x128xf32> to vector<8x128xf32>
    %272 = arith.addf %269, %271 : vector<8x128xf32>
    %cst_64 = arith.constant 0.000000e+00 : f32
    %273 = vector.broadcast %cst_64 : f32 to vector<8x128xf32>
    %274 = arith.maximumf %272, %273 : vector<8x128xf32>
    %275 = arith.truncf %274 : vector<8x128xf32> to vector<8x128xbf16>
    %c0_65 = arith.constant 0 : index
    %c0_66 = arith.constant 0 : index
    %276 = vector.load %arg6[%c0_65, %c0_66] : memref<128x128xbf16, #tpu.memory_space<vmem>>, vector<128x128xbf16>
    %cst_67 = arith.constant dense<0.000000e+00> : vector<8x128xf32>
    %277 = tpu.matmul %275, %276, %cst_67 {dimension_numbers = #tpu.dot_dimension_numbers<[1], [0], [0], [1], [0, 0, 1, 1], [], []>} : vector<8x128xbf16>, vector<128x128xbf16>, vector<8x128xf32> -> vector<8x128xf32>
    %c0_68 = arith.constant 0 : index
    %c0_69 = arith.constant 0 : index
    %278 = vector.load %arg7[%c0_68, %c0_69] : memref<1x128xf32, #tpu.memory_space<vmem>>, vector<1x128xf32>
    %279 = vector.broadcast %278 : vector<1x128xf32> to vector<8x128xf32>
    %280 = arith.addf %277, %279 : vector<8x128xf32>
    %cst_70 = arith.constant 0.000000e+00 : f32
    %281 = vector.broadcast %cst_70 : f32 to vector<8x128xf32>
    %282 = arith.maximumf %280, %281 : vector<8x128xf32>
    %c0_71 = arith.constant 0 : index
    %c0_72 = arith.constant 0 : index
    %283 = vector.load %arg8[%c0_71, %c0_72] : memref<8x128xf32, #tpu.memory_space<vmem>>, vector<8x128xf32>
    tpu.vector_store %arg8[%c0_71, %c0_72], %282 {strides = array<i32>} : memref<8x128xf32, #tpu.memory_space<vmem>>, vector<8x128xf32>,
    return
  }
}

</mosaic_0001>

<bundles_post_ra>
// kernel: tpu_custom_call.1
= control target key start
LH: loop header
LB: loop body
LE: loop exit
PB: predicated region body
PF: predicated region fallthrough
CT: control target
= control target key end

     0   :  { %13 = vsyncpa [#allocation4], 0  ;;  %s2830_s0 = inlined_call_operand.vmem [shape: f32[64,2], index: 0, kind: input, shape index: {}]   ;;  %s2831_s1 = inlined_call_operand.vmem [shape: bf16[2,512], index: 1, kind: input, shape index: {}]   ;;  %s2832_s2 = inlined_call_operand.hbm [shape: f32[1,512], index: 2, kind: input, shape index: {}]   ;;  %s2833_s3 = inlined_call_operand.hbm [shape: bf16[128,512], index: 3, kind: input, shape index: {}]   ;;  %s2834_s4 = inlined_call_operand.vmem [shape: bf16[128,128], index: 4, kind: input, shape index: {}]   ;;  %s2835_s5 = inlined_call_operand.vmem [shape: f32[1,128], index: 5, kind: input, shape index: {}]   ;;  %s2836_s6 = inlined_call_operand.hbm [shape: bf16[128,128], index: 6, kind: input, shape index: {}]   ;;  %s2837_s7 = inlined_call_operand.vmem [shape: f32[1,128], index: 7, kind: input, shape index: {}]   ;;  %s2838_s8 = inlined_call_operand.hbm [shape: f32[8,128], index: 8, kind: output, shape index: {}]  }
   0x1   :  { %14 = vsyncpa [#allocation7], 0  ;;  %s35_s29 = sshll.u32 %s2833_s3, 4  ;;  %s36_s29 = int_to_ptr.hbm [resolvable:$true] %s35_s29 }
   0x2   :  { %15 = vsyncpa [#allocation5], 0  ;;  %s2197_s30 = smov [#allocation6]   ;;  %s25_s12 = sshll.u32 %s2832_s2, 4  ;;  %s26_s12 = int_to_ptr.hbm [resolvable:$true] %s25_s12 }
   0x3   :  { %s37_s9 = sshll.u32 %s2197_s30, 4  ;;  %s2198_s13 = smov 256   ;;  %s38_s9 = int_to_ptr.vmem [resolvable:$true] %s37_s9 }
   0x4   :  { %s2199_s14 = smov 16   ;;  %s2200_s15 = smov [#allocation3]  }
   0x5   :  { %43 = dma.hbm_to_vmem [thread:$0]  %s36_s29, 4096, %s38_s9, [#allocation7], %s2198_s13, %s2198_s13, %s2199_s14  }
   0x6   :  { %s27_s16 = sshll.u32 %s2200_s15, 4  ;;  %s52_s19 = sshll.u32 %s2836_s6, 4  ;;  %s28_s16 = int_to_ptr.vmem [resolvable:$true] %s27_s16  ;;  %s53_s19 = int_to_ptr.hbm [resolvable:$true] %s52_s19 }
   0x7   :  { %30 = dma.hbm_to_vmem [thread:$0]  %s26_s12, 64, %s28_s16, [#allocation4]  }
   0x8   :  { %s2201_s3 = smov [#allocation8]   ;;  %s2202_s21 = smov 64  }
   0x9   :  { %s54_s20 = sshll.u32 %s2201_s3, 4  ;;  %s2203_s22 = smov 4   ;;  %s55_s20 = int_to_ptr.vmem [resolvable:$true] %s54_s20 }
   0xa   :  { %60 = dma.hbm_to_vmem [thread:$0]  %s53_s19, 1024, %s55_s20, [#allocation7], %s2202_s21, %s2202_s21, %s2203_s22  }
   0xb   :  { %2191 = dma.done.wait [#allocation4], 64  }
   0xc   :  { %2192 = vsyncadd [#allocation4], 4294967232 }
   0xd   :  { %2193 = dma.done.wait [#allocation7], 5120  }
   0xe   :  { %2194 = vsyncadd [#allocation7], 4294962176  ;;  %v88_v0 = vld [vmem:[%s2831_s1] sm:$0xf]  ;;  %vm118_vm0 = vcmask 1040384   ;;  %v77_v2 = vld [vmem:[%s2830_s0 + $0x8] sm:$0xff] }
   0xf   :  { %100 = vst [vmem:[#allocation1] ss:$9 sm:$0xff] %v88_v0  ;;  %v76_v1 = vld [vmem:[%s2830_s0] sm:$0xff]  ;;  %v82_v3 = vld [vmem:[%s2830_s0 + $0x30] sm:$0xff]  ;;  %v83_v4 = vld [vmem:[%s2830_s0 + $0x38] sm:$0xff]  ;;  %vm105_vm1 = vcmask 15360  }
  0x10   :  { %v1935_v5 = vld [vmem:[#allocation6 + $0xec] sm:$0xf]  ;;  %v1814_v6 = vld [vmem:[#allocation6 + $0xf8] sm:$0xf0]  ;;  %v1804_v7 = vld [vmem:[#allocation6 + $0xe0] sm:$0xf]  ;;  %v2275_v14 = vpack.c.bf16 %v77_v2, %v76_v1  ;;  %v2279_v18 = vpack.c.bf16 %v83_v4, %v82_v3 }
  0x11   :  { %v1936_v8 = vld [vmem:[#allocation6 + $0xec] sm:$0xf0]  ;;  %v1934_v9 = vld [vmem:[#allocation6 + $0xe4] sm:$0xf]  ;;  %v1806_v10 = vld [vmem:[#allocation6 + $0xf0] sm:$0xf0]  ;;  %v2283_v23 = vor.u32 %v1935_v5, %v1814_v6 }
  0x12   :  { %v1812_v11 = vld [vmem:[#allocation6 + $0xe8] sm:$0xf]  ;;  %v1937_v21 = vld [vmem:[#allocation6 + $0xf4] sm:$0xf0]  ;;  %v2285_v24 = vor.u32 %v1936_v8, %v1804_v7  ;;  %v1788_v25 = vld [vmem:[#allocation6 + $0xc0] sm:$0xf]  ;;  %v2287_v27 = vor.u32 %v1934_v9, %v1806_v10 }
  0x13   :  { %v1932_v26 = vld [vmem:[#allocation6 + $0xcc] sm:$0xf0]  ;;  %v1930_v28 = vld [vmem:[#allocation6 + $0xc4] sm:$0xf]  ;;  %v1931_v29 = vld [vmem:[#allocation6 + $0xcc] sm:$0xf]  ;;  %v2289_v31 = vor.u32 %v1937_v21, %v1812_v11 }
  0x14   :  { %v1798_v30 = vld [vmem:[#allocation6 + $0xd8] sm:$0xf0]  ;;  %v1790_v32 = vld [vmem:[#allocation6 + $0xd0] sm:$0xf0]  ;;  %v1796_v33 = vld [vmem:[#allocation6 + $0xc8] sm:$0xf]  ;;  %v2301_v34 = vor.u32 %v1932_v26, %v1788_v25 }
  0x15   :  { %v2303_v35 = vor.u32 %v1931_v29, %v1798_v30  ;;  %v1772_v36 = vld [vmem:[#allocation6 + $0xa0] sm:$0xf]  ;;  %v1933_v37 = vld [vmem:[#allocation6 + $0xd4] sm:$0xf0]  ;;  %v2306_v38 = vor.u32 %v1930_v28, %v1790_v32  ;;  %v1928_v39 = vld [vmem:[#allocation6 + $0xac] sm:$0xf0] }
  0x16   :  { %v101_v12 = vld [vmem:[#allocation1] sm:$0xff]  ;;  %v102_v13 = vld [vmem:[#allocation1 + $0x9] sm:$0xff]  ;;  %v103_v20 = vld [vmem:[#allocation1 + $0x12] sm:$0xff]  ;;  %v2309_v42 = vor.u32 %v1933_v37, %v1796_v33  ;;  %v2313_v46 = vor.u32 %v1928_v39, %v1772_v36  ;;  %s2205_s1 = smov [#allocation9]   ;;  %s1656_s12 = sshll.u32 %s2838_s8, 4  ;;  %s1657_s12 = int_to_ptr.hbm [resolvable:$true] %s1656_s12 }
  0x17   :  { %v104_v15 = vld [vmem:[#allocation1 + $0x1b] sm:$0xff]  ;;  %v119_v16 = vsel %vm118_vm0, %v101_v12, 0  ;;  %v121_v17 = vsel %vm118_vm0, %v102_v13, 0  ;;  %v123_v22 = vsel %vm118_vm0, %v103_v20, 0  ;;  %v1782_v41 = vld [vmem:[#allocation6 + $0xb8] sm:$0xf0] }
  0x18   :  { %v125_v19 = vsel %vm118_vm0, %v104_v15, 0  ;;  %134 = vmatpush.bf16.msra.mxu0 %v119_v16  ;;  %1954 = vmatpush.bf16.msra.mxu2 %v119_v16  ;;  %v1927_v40 = vld [vmem:[#allocation6 + $0xac] sm:$0xf]  ;;  %v1926_v43 = vld [vmem:[#allocation6 + $0xa4] sm:$0xf]  ;;  %s1654_s9 = sshll.u32 %s2205_s1, 4  ;;  %s1655_s9 = int_to_ptr.vmem [resolvable:$true] %s1654_s9 }
  0x19   :  { %163 = vmatpush.bf16.msra.mxu1 %v121_v17  ;;  %1955 = vmatpush.bf16.msra.mxu3 %v121_v17  ;;  %v1774_v44 = vld [vmem:[#allocation6 + $0xb0] sm:$0xf0]  ;;  %v1780_v45 = vld [vmem:[#allocation6 + $0xa8] sm:$0xf]  ;;  %v1756_v47 = vld [vmem:[#allocation6 + $0x80] sm:$0xf]  ;;  %v2315_v48 = vor.u32 %v1927_v40, %v1782_v41 }
  0x1a   :  { %v1929_v49 = vld [vmem:[#allocation6 + $0xb4] sm:$0xf0]  ;;  %v2318_v50 = vor.u32 %v1926_v43, %v1774_v44  ;;  %v1924_v51 = vld [vmem:[#allocation6 + $0x8c] sm:$0xf0]  ;;  %v1923_v52 = vld [vmem:[#allocation6 + $0x8c] sm:$0xf] }
  0x1b   :  { %1674 = vmatmul.msk.bf16.vlgmr.msra.gmra.mxu0 %vm105_vm1, %v2275_v14  ;;  %1677 = vmatmul.msk.bf16.vlgmr.msra.gmra.mxu2 %vm105_vm1, %v2279_v18  ;;  %v1766_v53 = vld [vmem:[#allocation6 + $0x98] sm:$0xf0]  ;;  %v2321_v54 = vor.u32 %v1929_v49, %v1780_v45  ;;  %v1922_v55 = vld [vmem:[#allocation6 + $0x84] sm:$0xf]  ;;  %v1758_v56 = vld [vmem:[#allocation6 + $0x90] sm:$0xf0]  ;;  %v2330_v59 = vor.u32 %v1924_v51, %v1756_v47 }
  0x1c   :  { %192 = vmatpush.bf16.msrb.mxu2 %v123_v22  ;;  %1678 = vmatmul.msk.bf16.vlgmr.msra.gmra.mxu1 %vm105_vm1, %v2275_v14  ;;  %v78_v57 = vld [vmem:[%s2830_s0 + $0x10] sm:$0xff]  ;;  %v79_v58 = vld [vmem:[%s2830_s0 + $0x18] sm:$0xff]  ;;  %v2333_v60 = vor.u32 %v1923_v52, %v1766_v53  ;;  %v2336_v61 = vor.u32 %v1922_v55, %v1758_v56  ;;  %v1740_v62 = vld [vmem:[#allocation6 + $0x60] sm:$0xf] }
  0x1d   :  { %221 = vmatpush.bf16.msrb.mxu3 %v125_v19  ;;  %474 = vmatpush.bf16.msrb.mxu0 %v2285_v24  ;;  %v1920_v63 = vld [vmem:[#allocation6 + $0x6c] sm:$0xf0]  ;;  %v85_v0 = vpack.c.bf16 %v79_v58, %v78_v57  ;;  %v1918_v1 = vld [vmem:[#allocation6 + $0x64] sm:$0xf]  ;;  %v1742_v2 = vld [vmem:[#allocation6 + $0x70] sm:$0xf0] }
  0x1e   :  { %1681 = vmatmul.msk.bf16.vlgmr.msra.gmra.mxu3 %vm105_vm1, %v2279_v18  ;;  %487 = vmatpush.bf16.msrb.mxu1 %v2287_v27  ;;  %v2340_v3 = vor.u32 %v1920_v63, %v1740_v62  ;;  %v2344_v4 = vor.u32 %v1918_v1, %v1742_v2  ;;  %v1724_v5 = vld [vmem:[#allocation6 + $0x40] sm:$0xf]  ;;  %v1916_v6 = vld [vmem:[#allocation6 + $0x4c] sm:$0xf0]  ;;  %v1914_v7 = vld [vmem:[#allocation6 + $0x44] sm:$0xf] }
  0x1f   :  { %v1726_v8 = vld [vmem:[#allocation6 + $0x50] sm:$0xf0]  ;;  %v1708_v9 = vld [vmem:[#allocation6 + $0x20] sm:$0xf]  ;;  %v1919_v10 = vld [vmem:[#allocation6 + $0x6c] sm:$0xf]  ;;  %v2353_v13 = vor.u32 %v1916_v6, %v1724_v5 }
  0x20   :  { %500 = vmatpush.bf16.msra.mxu2 %v2289_v31  ;;  %v1750_v11 = vld [vmem:[#allocation6 + $0x78] sm:$0xf0]  ;;  %v1764_v12 = vld [vmem:[#allocation6 + $0x88] sm:$0xf]  ;;  %v1925_v16 = vld [vmem:[#allocation6 + $0x94] sm:$0xf0]  ;;  %v2358_v20 = vor.u32 %v1914_v7, %v1726_v8 }
  0x21   :  { %513 = vmatpush.bf16.msra.mxu3 %v2283_v23  ;;  %475 = vmatpush.bf16.msrb.mxu0 %v2301_v34  ;;  %v2355_v15 = vor.u32 %v1919_v10, %v1750_v11  ;;  %v1915_v17 = vld [vmem:[#allocation6 + $0x4c] sm:$0xf]  ;;  %v1734_v19 = vld [vmem:[#allocation6 + $0x58] sm:$0xf0]  ;;  %v1912_v21 = vld [vmem:[#allocation6 + $0x2c] sm:$0xf0]  ;;  %v2360_v22 = vor.u32 %v1925_v16, %v1764_v12 }
  0x22   :  { %488 = vmatpush.bf16.msrb.mxu1 %v2306_v38  ;;  %v1921_v25 = vld [vmem:[#allocation6 + $0x74] sm:$0xf0]  ;;  %v1910_v26 = vld [vmem:[#allocation6 + $0x24] sm:$0xf]  ;;  %v1710_v28 = vld [vmem:[#allocation6 + $0x30] sm:$0xf0]  ;;  %v2363_v29 = vor.u32 %v1915_v17, %v1734_v19  ;;  %v2369_v32 = vor.u32 %v1912_v21, %v1708_v9 }
  0x23   :  { %v2372_v33 = vor.u32 %v1910_v26, %v1710_v28  ;;  %v1692_v36 = vld [vmem:[#allocation6] sm:$0xf]  ;;  %v1908_v37 = vld [vmem:[#allocation6 + $0xc] sm:$0xf0]  ;;  %v1906_v39 = vld [vmem:[#allocation6 + $0x4] sm:$0xf] }
  0x24   :  { %501 = vmatpush.bf16.msra.mxu2 %v2309_v42  ;;  %v1694_v40 = vld [vmem:[#allocation6 + $0x10] sm:$0xf0]  ;;  %v81_v43 = vld [vmem:[%s2830_s0 + $0x28] sm:$0xff]  ;;  %v2383_v44 = vor.u32 %v1908_v37, %v1692_v36  ;;  %v1911_v49 = vld [vmem:[#allocation6 + $0x2c] sm:$0xf]  ;;  %v2204_v7 = vmov 0  }
  0x25   :  { %514 = vmatpush.bf16.msra.mxu3 %v2303_v35  ;;  %476 = vmatpush.bf16.msrb.mxu0 %v2313_v46  ;;  %v80_v41 = vld [vmem:[%s2830_s0 + $0x20] sm:$0xff]  ;;  %v2386_v45 = vor.u32 %v1906_v39, %v1694_v40  ;;  %v1718_v51 = vld [vmem:[#allocation6 + $0x38] sm:$0xf0]  ;;  %v1732_v52 = vld [vmem:[#allocation6 + $0x48] sm:$0xf] }
  0x26   :  { %489 = vmatpush.bf16.msrb.mxu1 %v2318_v50  ;;  %v86_v47 = vpack.c.bf16 %v81_v43, %v80_v41  ;;  %v2395_v53 = vor.u32 %v1911_v49, %v1718_v51  ;;  %v1917_v55 = vld [vmem:[#allocation6 + $0x54] sm:$0xf0]  ;;  %v1907_v56 = vld [vmem:[#allocation6 + $0xc] sm:$0xf]  ;;  %v1702_v57 = vld [vmem:[#allocation6 + $0x18] sm:$0xf0] }
  0x27   :  { %v2398_v58 = vor.u32 %v1917_v55, %v1732_v52  ;;  %v1716_v62 = vld [vmem:[#allocation6 + $0x28] sm:$0xf]  ;;  %v1913_v63 = vld [vmem:[#allocation6 + $0x34] sm:$0xf0]  ;;  %v2402_v1 = vor.u32 %v1907_v56, %v1702_v57  ;;  %v89_v8 = vld [vmem:[#allocation3] sm:$0xf] }
  0x28   :  { %502 = vmatpush.bf16.msra.mxu2 %v2321_v54  ;;  %v1700_v2 = vld [vmem:[#allocation6 + $0x8] sm:$0xf]  ;;  %v1909_v5 = vld [vmem:[#allocation6 + $0x14] sm:$0xf0]  ;;  %v2479_v10 = vperm.slane %v89_v8, 0  ;;  %v2481_v11 = vperm.slane %v89_v8, 1 }
  0x29   :  { %515 = vmatpush.bf16.msra.mxu3 %v2315_v48  ;;  %477 = vmatpush.bf16.msrb.mxu0 %v2330_v59  ;;  %v2411_v6 = vor.u32 %v1909_v5, %v1700_v2  ;;  %v2515_v56 = vperm.slane %v89_v8, 2  ;;  %v2517_v57 = vperm.slane %v89_v8, 3 }
  0x2a   :  { %490 = vmatpush.bf16.msrb.mxu1 %v2336_v61  ;;  %2841 = vst [vmem:[#allocation13_spill] sm:$0xff] %v2479_v10 }
  0x2b   :  { %1675 = vmatmul.msk.bf16.gmra.mxu0 %vm105_vm1, %v85_v0  ;;  %1682 = vmatmul.msk.bf16.vlgmr.msrb.gmra.mxu2 %vm105_vm1, %v2275_v14  ;;  %2842 = vst [vmem:[#allocation14_spill] sm:$0xff] %v2481_v11 }
  0x2c   :  { %1679 = vmatmul.msk.bf16.gmra.mxu1 %vm105_vm1, %v85_v0  ;;  %503 = vmatpush.bf16.msra.mxu2 %v2360_v22 }
  0x2d   :  { %516 = vmatpush.bf16.msra.mxu3 %v2333_v60  ;;  %478 = vmatpush.bf16.msrb.mxu0 %v2340_v3 }
  0x2e   :  { %1686 = vmatmul.msk.bf16.vlgmr.msrb.gmra.mxu3 %vm105_vm1, %v2275_v14  ;;  %491 = vmatpush.bf16.msrb.mxu1 %v2344_v4  ;;  %v1748_v14 = vld [vmem:[#allocation6 + $0x68] sm:$0xf] }
  0x2f   :  { %v2366_v30 = vor.u32 %v1921_v25, %v1748_v14 }
  0x31   :  { %517 = vmatpush.bf16.msra.mxu3 %v2355_v15  ;;  %479 = vmatpush.bf16.msrb.mxu0 %v2353_v13 }
  0x32   :  { %492 = vmatpush.bf16.msrb.mxu1 %v2358_v20  ;;  %504 = vmatpush.bf16.msra.mxu2 %v2366_v30 }
  0x35   :  { %518 = vmatpush.bf16.msra.mxu3 %v2363_v29  ;;  %480 = vmatpush.bf16.msrb.mxu0 %v2369_v32 }
  0x36   :  { %493 = vmatpush.bf16.msrb.mxu1 %v2372_v33  ;;  %505 = vmatpush.bf16.msra.mxu2 %v2398_v58 }
  0x39   :  { %481 = vmatpush.bf16.msrb.mxu0 %v2383_v44  ;;  %519 = vmatpush.bf16.msra.mxu3 %v2395_v53 }
  0x3a   :  { %494 = vmatpush.bf16.msrb.mxu1 %v2386_v45 }
  0x3b   :  { %1676 = vmatmul.msk.bf16.gmra.mxu0 %vm105_vm1, %v86_v47  ;;  %1683 = vmatmul.msk.bf16.gmra.mxu2 %vm105_vm1, %v85_v0 }
  0x3c   :  { %1680 = vmatmul.msk.bf16.gmra.mxu1 %vm105_vm1, %v86_v47 }
  0x3d   :  { %601 = vmatpush.bf16.msra.mxu0 %v2285_v24  ;;  %520 = vmatpush.bf16.msra.mxu3 %v2402_v1 }
  0x3e   :  { %1687 = vmatmul.msk.bf16.gmra.mxu3 %vm105_vm1, %v85_v0  ;;  %614 = vmatpush.bf16.msra.mxu1 %v2287_v27  ;;  %v2405_v0 = vor.u32 %v1913_v63, %v1716_v62 }
  0x40   :  { %506 = vmatpush.bf16.msra.mxu2 %v2405_v0 }
  0x41   :  { %602 = vmatpush.bf16.msra.mxu0 %v2301_v34  ;;  %640 = vmatpush.bf16.msrb.mxu3 %v2283_v23 }
  0x42   :  { %615 = vmatpush.bf16.msra.mxu1 %v2306_v38 }
  0x44   :  { %507 = vmatpush.bf16.msra.mxu2 %v2411_v6 }
  0x45   :  { %603 = vmatpush.bf16.msra.mxu0 %v2313_v46  ;;  %641 = vmatpush.bf16.msrb.mxu3 %v2303_v35 }
  0x46   :  { %616 = vmatpush.bf16.msra.mxu1 %v2318_v50 }
  0x48   :  { %627 = vmatpush.bf16.msrb.mxu2 %v2289_v31 }
  0x49   :  { %604 = vmatpush.bf16.msra.mxu0 %v2330_v59  ;;  %642 = vmatpush.bf16.msrb.mxu3 %v2315_v48 }
  0x4a   :  { %617 = vmatpush.bf16.msra.mxu1 %v2336_v61 }
  0x4b   :  { %1684 = vmatmul.msk.bf16.gmra.mxu2 %vm105_vm1, %v86_v47  ;;  %482 = vmatmul.bf16.vlgmr.msrb.gmra.mxu0 %v2204_v7 }
  0x4c   :  { %495 = vmatmul.bf16.vlgmr.msrb.gmra.mxu1 %v2204_v7  ;;  %628 = vmatpush.bf16.msrb.mxu2 %v2309_v42 }
  0x4d   :  { %605 = vmatpush.bf16.msra.mxu0 %v2340_v3  ;;  %643 = vmatpush.bf16.msrb.mxu3 %v2333_v60 }
  0x4e   :  { %1688 = vmatmul.msk.bf16.gmra.mxu3 %vm105_vm1, %v86_v47  ;;  %618 = vmatpush.bf16.msra.mxu1 %v2344_v4 }
  0x50   :  { %629 = vmatpush.bf16.msrb.mxu2 %v2321_v54 }
  0x51   :  { %606 = vmatpush.bf16.msra.mxu0 %v2353_v13  ;;  %644 = vmatpush.bf16.msrb.mxu3 %v2355_v15 }
  0x52   :  { %619 = vmatpush.bf16.msra.mxu1 %v2358_v20 }
  0x54   :  { %630 = vmatpush.bf16.msrb.mxu2 %v2360_v22 }
  0x55   :  { %607 = vmatpush.bf16.msra.mxu0 %v2369_v32  ;;  %645 = vmatpush.bf16.msrb.mxu3 %v2363_v29 }
  0x56   :  { %620 = vmatpush.bf16.msra.mxu1 %v2372_v33 }
  0x58   :  { %631 = vmatpush.bf16.msrb.mxu2 %v2366_v30 }
  0x59   :  { %608 = vmatpush.bf16.msra.mxu0 %v2383_v44  ;;  %646 = vmatpush.bf16.msrb.mxu3 %v2395_v53 }
  0x5a   :  { %621 = vmatpush.bf16.msra.mxu1 %v2386_v45 }
  0x5b   :  { %1685 = vmatmul.msk.bf16.gmra.mxu2 %vm105_vm1, %v2279_v18 }
  0x5c   :  { %632 = vmatpush.bf16.msrb.mxu2 %v2398_v58 }
  0x5d   :  { %728 = vmatpush.bf16.msrb.mxu0 %v2285_v24  ;;  %647 = vmatpush.bf16.msrb.mxu3 %v2402_v1 }
  0x5e   :  { %741 = vmatpush.bf16.msrb.mxu1 %v2287_v27  ;;  %1689 = vmatmul.msk.bf16.gmra.mxu3 %vm105_vm1, %v2279_v18 }
  0x60   :  { %633 = vmatpush.bf16.msrb.mxu2 %v2405_v0 }
  0x61   :  { %729 = vmatpush.bf16.msrb.mxu0 %v2301_v34 }
  0x62   :  { %742 = vmatpush.bf16.msrb.mxu1 %v2306_v38 }
  0x64   :  { %634 = vmatpush.bf16.msrb.mxu2 %v2411_v6 }
  0x65   :  { %730 = vmatpush.bf16.msrb.mxu0 %v2313_v46 }
  0x66   :  { %743 = vmatpush.bf16.msrb.mxu1 %v2318_v50 }
  0x69   :  { %731 = vmatpush.bf16.msrb.mxu0 %v2330_v59 }
  0x6a   :  { %744 = vmatpush.bf16.msrb.mxu1 %v2336_v61 }
  0x6b   :  { %508 = vmatmul.bf16.vlgmr.msra.gmra.mxu2 %v2204_v7 }
  0x6c   :  { %754 = vmatpush.bf16.msra.mxu2 %v2289_v31 }
  0x6d   :  { %732 = vmatpush.bf16.msrb.mxu0 %v2340_v3 }
  0x6e   :  { %745 = vmatpush.bf16.msrb.mxu1 %v2344_v4  ;;  %521 = vmatmul.bf16.vlgmr.msra.gmra.mxu3 %v2204_v7 }
  0x6f   :  { %767 = vmatpush.bf16.msra.mxu3 %v2283_v23 }
  0x70   :  { %755 = vmatpush.bf16.msra.mxu2 %v2309_v42 }
  0x71   :  { %733 = vmatpush.bf16.msrb.mxu0 %v2353_v13 }
  0x72   :  { %746 = vmatpush.bf16.msrb.mxu1 %v2358_v20 }
  0x73   :  { %768 = vmatpush.bf16.msra.mxu3 %v2303_v35 }
  0x74   :  { %756 = vmatpush.bf16.msra.mxu2 %v2321_v54 }
  0x75   :  { %734 = vmatpush.bf16.msrb.mxu0 %v2369_v32 }
  0x76   :  { %747 = vmatpush.bf16.msrb.mxu1 %v2372_v33 }
  0x77   :  { %769 = vmatpush.bf16.msra.mxu3 %v2315_v48 }
  0x78   :  { %757 = vmatpush.bf16.msra.mxu2 %v2360_v22 }
  0x79   :  { %735 = vmatpush.bf16.msrb.mxu0 %v2383_v44 }
  0x7a   :  { %748 = vmatpush.bf16.msrb.mxu1 %v2386_v45 }
  0x7b   :  { %770 = vmatpush.bf16.msra.mxu3 %v2333_v60 }
  0x7c   :  { %758 = vmatpush.bf16.msra.mxu2 %v2366_v30 }
  0x7f   :  { %771 = vmatpush.bf16.msra.mxu3 %v2355_v15 }
  0x80   :  { %759 = vmatpush.bf16.msra.mxu2 %v2398_v58 }
  0x83   :  { %772 = vmatpush.bf16.msra.mxu3 %v2363_v29 }
  0x84   :  { %760 = vmatpush.bf16.msra.mxu2 %v2405_v0 }
  0x87   :  { %773 = vmatpush.bf16.msra.mxu3 %v2395_v53 }
  0x88   :  { %761 = vmatpush.bf16.msra.mxu2 %v2411_v6 }
  0x8b   :  { %774 = vmatpush.bf16.msra.mxu3 %v2402_v1 }
  0x98   :  { %v136_v18 = vpop.f32.mrf.mxu0 }
  0x99   :  { %v165_v9 = vpop.f32.mrf.mxu1 }
  0x9e   :  { %v151_v12 = vpop.f32.mrf.mxu2 }
  0x9f   :  { %v2484_v16 = vadd.f32 %v151_v12, %v2479_v10 }
  0xa0   :  { %v138_v21 = vpop.f32.mrf.mxu0 }
  0xa1   :  { %2843 = vst [vmem:[#allocation15_spill] sm:$0xff] %v2484_v16  ;;  %v180_v17 = vpop.f32.mrf.mxu3  ;;  %v2490_v14 = vadd.f32 %v138_v21, %v2479_v10  ;;  %v167_v25 = vpop.f32.mrf.mxu1 }
  0xa2   :  { %v2487_v19 = vadd.f32 %v180_v17, %v2481_v11  ;;  %v2493_v26 = vadd.f32 %v167_v25, %v2481_v11 }
  0xa4   :  { %2844 = vst [vmem:[#allocation16_spill] sm:$0xff] %v2487_v19 }
  0xa6   :  { %v2495_v28 = vpop.f32.mrf.mxu2 }
  0xa7   :  { %2845 = vst [vmem:[#allocation17_spill] sm:$0xff] %v2495_v28  ;;  %v166_v28 = vadd.f32 %v165_v9, %v2481_v11 }
  0xa8   :  { %v141_v37 = vpop.f32.mrf.mxu0 }
  0xa9   :  { %v2497_v36 = vpop.f32.mrf.mxu3  ;;  %v2500_v39 = vadd.f32 %v141_v37, %v2479_v10  ;;  %v170_v40 = vpop.f32.mrf.mxu1 }
  0xaa   :  { %2846 = vst [vmem:[#allocation18_spill] sm:$0xff] %v2497_v36  ;;  %v2503_v41 = vadd.f32 %v170_v40, %v2481_v11 }
  0xae   :  { %v2505_v43 = vpop.f32.mrf.mxu2 }
  0xb0   :  { %v143_v49 = vpop.f32.mrf.mxu0 }
  0xb1   :  { %v2507_v47 = vpop.f32.mrf.mxu3  ;;  %v2510_v51 = vadd.f32 %v143_v49, %v2479_v10  ;;  %v172_v52 = vpop.f32.mrf.mxu1 }
  0xb2   :  { %v2513_v55 = vadd.f32 %v172_v52, %v2481_v11 }
  0xb3   :  { %2847 = vst [vmem:[#allocation19_spill] sm:$0xff] %v2510_v51 }
  0xb4   :  { %2848 = vst [vmem:[#allocation20_spill] sm:$0xff] %v2513_v55 }
  0xb6   :  { %v196_v62 = vpop.f32.mrf.mxu2 }
  0xb7   :  { %v2520_v63 = vadd.f32 %v196_v62, %v2515_v56 }
  0xb8   :  { %v146_v7 = vpop.f32.mrf.mxu0 }
  0xb9   :  { %v225_v2 = vpop.f32.mrf.mxu3  ;;  %v2526_v12 = vadd.f32 %v146_v7, %v2479_v10  ;;  %v175_v17 = vpop.f32.mrf.mxu1 }
  0xba   :  { %v2523_v5 = vadd.f32 %v225_v2, %v2517_v57  ;;  %v2529_v21 = vadd.f32 %v175_v17, %v2481_v11  ;;  %v137_v17 = vadd.f32 %v136_v18, %v2479_v10 }
  0xbb   :  { %2849 = vst [vmem:[#allocation21_spill] sm:$0xff] %v2526_v12 }
  0xbc   :  { %2850 = vst [vmem:[#allocation22_spill] sm:$0xff] %v2529_v21 }
  0xbe   :  { %v199_v25 = vpop.f32.mrf.mxu2 }
  0xbf   :  { %v2532_v8 = vadd.f32 %v199_v25, %v2515_v56 }
  0xc0   :  { %v148_v49 = vpop.f32.mrf.mxu0 }
  0xc1   :  { %v228_v37 = vpop.f32.mrf.mxu3  ;;  %v2538_v52 = vadd.f32 %v148_v49, %v2479_v10  ;;  %v177_v62 = vpop.f32.mrf.mxu1 }
  0xc2   :  { %v2535_v40 = vadd.f32 %v228_v37, %v2517_v57  ;;  %v2541_v2 = vadd.f32 %v177_v62, %v2481_v11 }
  0xc3   :  { %2851 = vst [vmem:[#allocation23_spill] sm:$0xff] %v2538_v52 }
  0xc4   :  { %2852 = vst [vmem:[#allocation24_spill] sm:$0xff] %v2541_v2 }
  0xc6   :  { %v201_v7 = vpop.f32.mrf.mxu2 }
  0xc7   :  { %v2545_v36 = vadd.f32 %v201_v7, %v2515_v56 }
  0xc8   :  { %v483_v19 = vpop.f32.mrf.mxu0 }
  0xc9   :  { %2853 = vst [vmem:[#allocation25_spill] sm:$0xff] %v2545_v36  ;;  %v230_v25 = vpop.f32.mrf.mxu3  ;;  %v526_v16 = vadd.f32 %v483_v19, %v137_v17  ;;  %v496_v49 = vpop.f32.mrf.mxu1 }
  0xca   :  { %v2549_v37 = vadd.f32 %v230_v25, %v2517_v57  ;;  %v527_v52 = vadd.f32 %v496_v49, %v166_v28 }
  0xcb   :  { %v1818_v21 = vmul.f32 -1.442695, %v526_v16 }
  0xcc   :  { %2854 = vst [vmem:[#allocation26_spill] sm:$0xff] %v2549_v37  ;;  %v1819_v12 = vmul.f32 -1.442695, %v527_v52 }
  0xcd   :  { %1967 = vpow2.f32 %v1818_v21 }
  0xce   :  { %1969 = vpow2.f32 %v1819_v12  ;;  %v204_v62 = vpop.f32.mrf.mxu2 }
  0xcf   :  { %v2552_v18 = vadd.f32 %v204_v62, %v2515_v56 }
  0xd0   :  { %v485_v9 = vpop.f32.mrf.mxu0 }
  0xd1   :  { %2855 = vst [vmem:[#allocation27_spill] sm:$0xff] %v2552_v18  ;;  %v233_v7 = vpop.f32.mrf.mxu3  ;;  %v498_v11 = vpop.f32.mrf.mxu1 }
  0xd2   :  { %v2555_v10 = vadd.f32 %v233_v7, %v2517_v57 }
  0xd3   :  { %v1968_v25 = vpop.eup %1967 }
  0xd4   :  { %2856 = vst [vmem:[#allocation28_spill] sm:$0xff] %v2555_v10  ;;  %v1970_v2 = vpop.eup %1969  ;;  %v533_v17 = vadd.f32 1.0, %v1968_v25 }
  0xd5   :  { %v552_v36 = vadd.f32 1.0, %v1970_v2 }
  0xd6   :  { %v206_v19 = vpop.f32.mrf.mxu2  ;;  %vm539_vm6 = vweird.f32 %v533_v17 }
  0xd7   :  { %v2558_v16 = vadd.f32 %v206_v19, %v2515_v56  ;;  %1971 = vrcp.f32 %v552_v36  ;;  %vm558_vm3 = vweird.f32 %v552_v36 }
  0xd8   :  { %1973 = vrcp.f32 %v533_v17 }
  0xd9   :  { %2857 = vst [vmem:[#allocation29_spill] sm:$0xff] %v2558_v16  ;;  %v235_v28 = vpop.f32.mrf.mxu3 }
  0xda   :  { %v2561_v12 = vadd.f32 %v235_v28, %v2517_v57 }
  0xdc   :  { %2858 = vst [vmem:[#allocation30_spill] sm:$0xff] %v2561_v12 }
  0xdd   :  { %v1972_v52 = vpop.eup %1971 }
  0xde   :  { %v209_v21 = vpop.f32.mrf.mxu2  ;;  %v1974_v2 = vpop.eup %1973  ;;  %v554_v7 = vmul.f32 %v1972_v52, %v552_v36  ;;  %vm559_vm2 = vweird.f32 %v1972_v52 }
  0xdf   :  { %v2564_v49 = vadd.f32 %v209_v21, %v2515_v56  ;;  %v535_v9 = vmul.f32 %v1974_v2, %v533_v17  ;;  %vm540_vm4 = vweird.f32 %v1974_v2  ;;  %vm560_vm5 = vmor %vm558_vm3, %vm559_vm2 }
  0xe0   :  { %v555_v25 = vsub.f32 1.0, %v554_v7  ;;  %v564_v7 = vand.u32 2147483648, %v552_v36  ;;  %vm541_vm7 = vmor %vm539_vm6, %vm540_vm4 }
  0xe1   :  { %2859 = vst [vmem:[#allocation31_spill] sm:$0xff] %v2564_v49  ;;  %v238_v11 = vpop.f32.mrf.mxu3  ;;  %v536_v12 = vsub.f32 1.0, %v535_v9  ;;  %v195_v49 = vadd.f32 %v2505_v43, %v2515_v56  ;;  %v562_v9 = vand.u32 2147483647, %v552_v36 }
  0xe2   :  { %v2567_v62 = vadd.f32 %v238_v11, %v2517_v57  ;;  %v556_v10 = vmul.f32 %v1972_v52, %v555_v25  ;;  %v224_v11 = vadd.f32 %v2507_v47, %v2517_v57  ;;  %v565_v25 = vor.u32 1.1754944e-38, %v564_v7 }
  0xe3   :  { %v537_v21 = vmul.f32 %v1974_v2, %v536_v12  ;;  %v543_v12 = vand.u32 2147483647, %v533_v17  ;;  %vm563_vm8 = vcmp.eq.f32.partialorder %v562_v9, 8.507059e+37 }
  0xe4   :  { %2860 = vst [vmem:[#allocation32_spill] sm:$0xff] %v2567_v62  ;;  %v557_v37 = vadd.f32 %v1972_v52, %v556_v10 }
  0xe5   :  { %v538_v55 = vadd.f32 %v1974_v2, %v537_v21  ;;  %vm544_vm9 = vcmp.eq.f32.partialorder %v543_v12, 8.507059e+37 }
  0xe6   :  { %v211_v19 = vpop.f32.mrf.mxu2  ;;  %v561_v43 = vsel %vm560_vm5, %v1972_v52, %v557_v37 }
  0xe7   :  { %v2570_v16 = vadd.f32 %v211_v19, %v2515_v56  ;;  %v542_v47 = vsel %vm541_vm7, %v1974_v2, %v538_v55 }
  0xe9   :  { %2861 = vst [vmem:[#allocation33_spill] sm:$0xff] %v2570_v16  ;;  %v240_v28 = vpop.f32.mrf.mxu3 }
  0xea   :  { %v2573_v18 = vadd.f32 %v240_v28, %v2517_v57  ;;  %v566_v57 = vsel %vm563_vm8, %v565_v25, %v561_v43 }
  0xec   :  { %2862 = vst [vmem:[#allocation34_spill] sm:$0xff] %v2573_v18  ;;  %v545_v18 = vand.u32 2147483648, %v533_v17 }
  0xee   :  { %v509_v62 = vpop.f32.mrf.mxu2  ;;  %v546_v10 = vor.u32 1.1754944e-38, %v545_v18 }
  0xef   :  { %v528_v19 = vadd.f32 %v509_v62, %v195_v49 }
  0xf0   :  { %v547_v21 = vsel %vm544_vm9, %v546_v10, %v542_v47 }
  0xf1   :  { %v522_v16 = vpop.f32.mrf.mxu3  ;;  %1975 = vtanh.f32 %v528_v19 }
  0xf2   :  { %v529_v28 = vadd.f32 %v522_v16, %v224_v11  ;;  %v588_v16 = vmul.f32 0.0, %v566_v57 }
  0xf4   :  { %v1820_v56 = vmul.f32 -1.442695, %v529_v28 }
  0xf6   :  { %1977 = vpow2.f32 %v1820_v56  ;;  %v511_v49 = vpop.f32.mrf.mxu2 }
  0xf7   :  { %v1976_v62 = vpop.eup %1975 }
  0xf8   :  { %v589_v11 = vmul.f32 %v1976_v62, %v547_v21 }
  0xf9   :  { %v524_v36 = vpop.f32.mrf.mxu3 }
  0xfa   :  { %v2579_v19 = vadd.f32 %v589_v11, %v588_v16 }
  0xfc   :  { %v1978_v51 = vpop.eup %1977 }
  0xfd   :  { %v572_v17 = vadd.f32 1.0, %v1978_v51 }
  0xff   :  { %1979 = vrcp.f32 %v572_v17  ;;  %v584_v55 = vand.u32 2147483648, %v572_v17  ;;  %v582_v2 = vand.u32 2147483647, %v572_v17  ;;  %vm578_vm11 = vweird.f32 %v572_v17 }
 0x100   :  { %1981 = vtanh.f32 %v2579_v19 }
 0x101   :  { %v585_v28 = vor.u32 1.1754944e-38, %v584_v55  ;;  %vm583_vm13 = vcmp.eq.f32.partialorder %v582_v2, 8.507059e+37 }
 0x105   :  { %v1980_v37 = vpop.eup %1979 }
 0x106   :  { %v574_v52 = vmul.f32 %v1980_v37, %v572_v17  ;;  %vm579_vm10 = vweird.f32 %v1980_v37  ;;  %v1982_v43 = vpop.eup %1981 }
 0x107   :  { %vm580_vm12 = vmor %vm578_vm11, %vm579_vm10 }
 0x108   :  { %v575_v7 = vsub.f32 1.0, %v574_v52 }
 0x10a   :  { %v576_v18 = vmul.f32 %v1980_v37, %v575_v7 }
 0x10c   :  { %v577_v9 = vadd.f32 %v1980_v37, %v576_v18 }
 0x10e   :  { %v581_v12 = vsel %vm580_vm12, %v1980_v37, %v577_v9 }
 0x10f   :  { %v586_v56 = vsel %vm583_vm13, %v585_v28, %v581_v12 }
 0x110   :  { %v592_v25 = vmul.f32 %v1982_v43, %v586_v56 }
 0x112   :  { %v600_v51 = vpack.c.bf16 %v592_v25, %v592_v25 }
 0x114   :  { %609 = vmatmul.bf16.vlgmr.msra.gmra.mxu0 %v600_v51  ;;  %622 = vmatmul.bf16.vlgmr.msra.gmra.mxu1 %v600_v51 }
 0x115   :  { %635 = vmatmul.bf16.vlgmr.msrb.gmra.mxu2 %v600_v51  ;;  %648 = vmatmul.bf16.vlgmr.msrb.gmra.mxu3 %v600_v51 }
 0x116   :  { %855 = vmatpush.bf16.msra.mxu0 %v2285_v24  ;;  %868 = vmatpush.bf16.msra.mxu1 %v2287_v27 }
 0x117   :  { %881 = vmatpush.bf16.msrb.mxu2 %v2289_v31  ;;  %894 = vmatpush.bf16.msrb.mxu3 %v2283_v23 }
 0x11a   :  { %856 = vmatpush.bf16.msra.mxu0 %v2301_v34  ;;  %869 = vmatpush.bf16.msra.mxu1 %v2306_v38 }
 0x11b   :  { %882 = vmatpush.bf16.msrb.mxu2 %v2309_v42  ;;  %895 = vmatpush.bf16.msrb.mxu3 %v2303_v35 }
 0x11e   :  { %857 = vmatpush.bf16.msra.mxu0 %v2313_v46  ;;  %870 = vmatpush.bf16.msra.mxu1 %v2318_v50 }
 0x11f   :  { %883 = vmatpush.bf16.msrb.mxu2 %v2321_v54  ;;  %896 = vmatpush.bf16.msrb.mxu3 %v2315_v48 }
 0x122   :  { %858 = vmatpush.bf16.msra.mxu0 %v2330_v59  ;;  %871 = vmatpush.bf16.msra.mxu1 %v2336_v61 }
 0x123   :  { %884 = vmatpush.bf16.msrb.mxu2 %v2360_v22  ;;  %897 = vmatpush.bf16.msrb.mxu3 %v2333_v60 }
 0x126   :  { %859 = vmatpush.bf16.msra.mxu0 %v2340_v3  ;;  %872 = vmatpush.bf16.msra.mxu1 %v2344_v4 }
 0x127   :  { %885 = vmatpush.bf16.msrb.mxu2 %v2366_v30  ;;  %898 = vmatpush.bf16.msrb.mxu3 %v2355_v15 }
 0x12a   :  { %860 = vmatpush.bf16.msra.mxu0 %v2353_v13  ;;  %873 = vmatpush.bf16.msra.mxu1 %v2358_v20 }
 0x12b   :  { %886 = vmatpush.bf16.msrb.mxu2 %v2398_v58  ;;  %899 = vmatpush.bf16.msrb.mxu3 %v2363_v29 }
 0x12e   :  { %861 = vmatpush.bf16.msra.mxu0 %v2369_v32  ;;  %874 = vmatpush.bf16.msra.mxu1 %v2372_v33 }
 0x12f   :  { %887 = vmatpush.bf16.msrb.mxu2 %v2405_v0  ;;  %900 = vmatpush.bf16.msrb.mxu3 %v2395_v53 }
 0x132   :  { %862 = vmatpush.bf16.msra.mxu0 %v2383_v44  ;;  %875 = vmatpush.bf16.msra.mxu1 %v2386_v45 }
 0x133   :  { %888 = vmatpush.bf16.msrb.mxu2 %v2411_v6  ;;  %901 = vmatpush.bf16.msrb.mxu3 %v2402_v1 }
 0x191   :  { %v610_v47 = vpop.f32.mrf.mxu0  ;;  %v623_v10 = vpop.f32.mrf.mxu1 }
 0x192   :  { %v653_v57 = vadd.f32 %v610_v47, %v2490_v14  ;;  %v654_v49 = vadd.f32 %v623_v10, %v2493_v26 }
 0x194   :  { %v1821_v62 = vmul.f32 -1.442695, %v653_v57  ;;  %v1822_v21 = vmul.f32 -1.442695, %v654_v49 }
 0x196   :  { %1983 = vpow2.f32 %v1821_v62 }
 0x197   :  { %1985 = vpow2.f32 %v1822_v21 }
 0x198   :  { %v636_v36 = vpop.f32.mrf.mxu2  ;;  %v649_v16 = vpop.f32.mrf.mxu3 }
 0x199   :  { %v656_v11 = vadd.f32 %v649_v16, %v2523_v5  ;;  %v612_v17 = vpop.f32.mrf.mxu0  ;;  %v625_v37 = vpop.f32.mrf.mxu1  ;;  %v655_v43 = vadd.f32 %v636_v36, %v2520_v63 }
 0x19b   :  { %v1823_v52 = vmul.f32 -1.442695, %v656_v11 }
 0x19c   :  { %v1984_v7 = vpop.eup %1983 }
 0x19d   :  { %v1986_v55 = vpop.eup %1985  ;;  %v660_v18 = vadd.f32 1.0, %v1984_v7  ;;  %1987 = vpow2.f32 %v1823_v52 }
 0x19e   :  { %v679_v2 = vadd.f32 1.0, %v1986_v55 }
 0x19f   :  { %1989 = vrcp.f32 %v660_v18  ;;  %v672_v10 = vand.u32 2147483648, %v660_v18  ;;  %v670_v62 = vand.u32 2147483647, %v660_v18  ;;  %vm666_vm0 = vweird.f32 %v660_v18 }
 0x1a0   :  { %1991 = vrcp.f32 %v679_v2  ;;  %v638_v14 = vpop.f32.mrf.mxu2  ;;  %v651_v26 = vpop.f32.mrf.mxu3  ;;  %v691_v57 = vand.u32 2147483648, %v679_v2  ;;  %v689_v16 = vand.u32 2147483647, %v679_v2  ;;  %vm685_vm1 = vweird.f32 %v679_v2 }
 0x1a1   :  { %v673_v63 = vor.u32 1.1754944e-38, %v672_v10  ;;  %vm671_vm4 = vcmp.eq.f32.partialorder %v670_v62, 8.507059e+37 }
 0x1a2   :  { %v692_v52 = vor.u32 1.1754944e-38, %v691_v57  ;;  %vm690_vm5 = vcmp.eq.f32.partialorder %v689_v16, 8.507059e+37 }
 0x1a3   :  { %v1988_v9 = vpop.eup %1987 }
 0x1a4   :  { %v699_v28 = vadd.f32 1.0, %v1988_v9 }
 0x1a5   :  { %v1990_v12 = vpop.eup %1989 }
 0x1a6   :  { %v1992_v56 = vpop.eup %1991  ;;  %v662_v25 = vmul.f32 %v1990_v12, %v660_v18  ;;  %1993 = vrcp.f32 %v699_v28  ;;  %vm667_vm14 = vweird.f32 %v1990_v12  ;;  %vm705_vm7 = vweird.f32 %v699_v28 }
 0x1a7   :  { %v681_v5 = vmul.f32 %v1992_v56, %v679_v2  ;;  %1995 = vtanh.f32 %v655_v43  ;;  %vm686_vm15 = vweird.f32 %v1992_v56  ;;  %vm668_vm2 = vmor %vm666_vm0, %vm667_vm14 }
 0x1a8   :  { %v663_v51 = vsub.f32 1.0, %v662_v25  ;;  %vm687_vm3 = vmor %vm685_vm1, %vm686_vm15 }
 0x1a9   :  { %v682_v47 = vsub.f32 1.0, %v681_v5 }
 0x1aa   :  { %v664_v49 = vmul.f32 %v1990_v12, %v663_v51 }
 0x1ab   :  { %v683_v21 = vmul.f32 %v1992_v56, %v682_v47  ;;  %v711_v47 = vand.u32 2147483648, %v699_v28 }
 0x1ac   :  { %v1994_v11 = vpop.eup %1993  ;;  %v665_v17 = vadd.f32 %v1990_v12, %v664_v49 }
 0x1ad   :  { %v684_v36 = vadd.f32 %v1992_v56, %v683_v21  ;;  %v701_v37 = vmul.f32 %v1994_v11, %v699_v28  ;;  %v1996_v55 = vpop.eup %1995  ;;  %vm706_vm6 = vweird.f32 %v1994_v11  ;;  %v712_v57 = vor.u32 1.1754944e-38, %v711_v47 }
 0x1ae   :  { %v669_v7 = vsel %vm668_vm2, %v1990_v12, %v665_v17  ;;  %v709_v12 = vand.u32 2147483647, %v699_v28  ;;  %vm707_vm8 = vmor %vm705_vm7, %vm706_vm6 }
 0x1af   :  { %v674_v14 = vsel %vm671_vm4, %v673_v63, %v669_v7  ;;  %v688_v26 = vsel %vm687_vm3, %v1992_v56, %v684_v36  ;;  %v702_v9 = vsub.f32 1.0, %v701_v37 }
 0x1b0   :  { %v693_v43 = vsel %vm690_vm5, %v692_v52, %v688_v26  ;;  %v716_v25 = vmul.f32 %v1996_v55, %v674_v14  ;;  %vm710_vm9 = vcmp.eq.f32.partialorder %v709_v12, 8.507059e+37 }
 0x1b1   :  { %v715_v5 = vmul.f32 %v693_v43, %v2579_v19  ;;  %v703_v51 = vmul.f32 %v1994_v11, %v702_v9 }
 0x1b3   :  { %v2619_v18 = vadd.f32 %v716_v25, %v715_v5  ;;  %v704_v2 = vadd.f32 %v1994_v11, %v703_v51 }
 0x1b5   :  { %1997 = vtanh.f32 %v2619_v18  ;;  %v708_v10 = vsel %vm707_vm8, %v1994_v11, %v704_v2 }
 0x1b6   :  { %v713_v49 = vsel %vm710_vm9, %v712_v57, %v708_v10 }
 0x1bb   :  { %v1998_v56 = vpop.eup %1997 }
 0x1bc   :  { %v719_v62 = vmul.f32 %v1998_v56, %v713_v49 }
 0x1be   :  { %v727_v21 = vpack.c.bf16 %v719_v62, %v719_v62 }
 0x1c0   :  { %736 = vmatmul.bf16.vlgmr.msrb.gmra.mxu0 %v727_v21  ;;  %749 = vmatmul.bf16.vlgmr.msrb.gmra.mxu1 %v727_v21 }
 0x1c1   :  { %762 = vmatmul.bf16.vlgmr.msra.gmra.mxu2 %v727_v21  ;;  %775 = vmatmul.bf16.vlgmr.msra.gmra.mxu3 %v727_v21 }
 0x1c2   :  { %982 = vmatpush.bf16.msrb.mxu0 %v2285_v24  ;;  %995 = vmatpush.bf16.msrb.mxu1 %v2287_v27 }
 0x1c3   :  { %1008 = vmatpush.bf16.msra.mxu2 %v2289_v31  ;;  %1021 = vmatpush.bf16.msra.mxu3 %v2283_v23 }
 0x1c6   :  { %983 = vmatpush.bf16.msrb.mxu0 %v2301_v34  ;;  %996 = vmatpush.bf16.msrb.mxu1 %v2306_v38 }
 0x1c7   :  { %1009 = vmatpush.bf16.msra.mxu2 %v2309_v42  ;;  %1022 = vmatpush.bf16.msra.mxu3 %v2303_v35 }
 0x1ca   :  { %984 = vmatpush.bf16.msrb.mxu0 %v2313_v46  ;;  %997 = vmatpush.bf16.msrb.mxu1 %v2318_v50 }
 0x1cb   :  { %1010 = vmatpush.bf16.msra.mxu2 %v2321_v54  ;;  %1023 = vmatpush.bf16.msra.mxu3 %v2315_v48 }
 0x1ce   :  { %985 = vmatpush.bf16.msrb.mxu0 %v2330_v59  ;;  %998 = vmatpush.bf16.msrb.mxu1 %v2336_v61 }
 0x1cf   :  { %1011 = vmatpush.bf16.msra.mxu2 %v2360_v22  ;;  %1024 = vmatpush.bf16.msra.mxu3 %v2333_v60 }
 0x1d2   :  { %986 = vmatpush.bf16.msrb.mxu0 %v2340_v3  ;;  %999 = vmatpush.bf16.msrb.mxu1 %v2344_v4 }
 0x1d3   :  { %1012 = vmatpush.bf16.msra.mxu2 %v2366_v30  ;;  %1025 = vmatpush.bf16.msra.mxu3 %v2355_v15 }
 0x1d6   :  { %987 = vmatpush.bf16.msrb.mxu0 %v2353_v13  ;;  %1000 = vmatpush.bf16.msrb.mxu1 %v2358_v20 }
 0x1d7   :  { %1013 = vmatpush.bf16.msra.mxu2 %v2398_v58  ;;  %1026 = vmatpush.bf16.msra.mxu3 %v2363_v29 }
 0x1da   :  { %988 = vmatpush.bf16.msrb.mxu0 %v2369_v32  ;;  %1001 = vmatpush.bf16.msrb.mxu1 %v2372_v33 }
 0x1db   :  { %1014 = vmatpush.bf16.msra.mxu2 %v2405_v0  ;;  %1027 = vmatpush.bf16.msra.mxu3 %v2395_v53 }
 0x1de   :  { %989 = vmatpush.bf16.msrb.mxu0 %v2383_v44  ;;  %1002 = vmatpush.bf16.msrb.mxu1 %v2386_v45 }
 0x1df   :  { %1015 = vmatpush.bf16.msra.mxu2 %v2411_v6  ;;  %1028 = vmatpush.bf16.msra.mxu3 %v2402_v1 }
 0x23d   :  { %v737_v19 = vpop.f32.mrf.mxu0  ;;  %v750_v28 = vpop.f32.mrf.mxu1 }
 0x23e   :  { %v780_v16 = vadd.f32 %v737_v19, %v2500_v39  ;;  %v781_v11 = vadd.f32 %v750_v28, %v2503_v41 }
 0x240   :  { %v1824_v17 = vmul.f32 -1.442695, %v780_v16  ;;  %v1825_v63 = vmul.f32 -1.442695, %v781_v11 }
 0x242   :  { %1999 = vpow2.f32 %v1824_v17 }
 0x243   :  { %2001 = vpow2.f32 %v1825_v63 }
 0x244   :  { %v763_v36 = vpop.f32.mrf.mxu2  ;;  %v776_v37 = vpop.f32.mrf.mxu3 }
 0x245   :  { %v783_v52 = vadd.f32 %v776_v37, %v2535_v40  ;;  %v739_v7 = vpop.f32.mrf.mxu0  ;;  %v752_v55 = vpop.f32.mrf.mxu1  ;;  %v782_v47 = vadd.f32 %v763_v36, %v2532_v8 }
 0x247   :  { %v1826_v14 = vmul.f32 -1.442695, %v783_v52 }
 0x248   :  { %v2000_v26 = vpop.eup %1999 }
 0x249   :  { %v2002_v9 = vpop.eup %2001  ;;  %v787_v43 = vadd.f32 1.0, %v2000_v26  ;;  %2003 = vpow2.f32 %v1826_v14 }
 0x24a   :  { %v806_v25 = vadd.f32 1.0, %v2002_v9 }
 0x24b   :  { %2005 = vrcp.f32 %v787_v43  ;;  %v799_v49 = vand.u32 2147483648, %v787_v43  ;;  %v797_v19 = vand.u32 2147483647, %v787_v43  ;;  %vm793_vm12 = vweird.f32 %v787_v43 }
 0x24c   :  { %2007 = vrcp.f32 %v806_v25  ;;  %v765_v39 = vpop.f32.mrf.mxu2  ;;  %v778_v41 = vpop.f32.mrf.mxu3  ;;  %v818_v62 = vand.u32 2147483648, %v806_v25  ;;  %v816_v16 = vand.u32 2147483647, %v806_v25  ;;  %vm812_vm13 = vweird.f32 %v806_v25 }
 0x24d   :  { %v800_v8 = vor.u32 1.1754944e-38, %v799_v49  ;;  %vm798_vm0 = vcmp.eq.f32.partialorder %v797_v19, 8.507059e+37  ;;  %v2864_v19 = vld [vmem:[#allocation20_spill] sm:$0xff] }
 0x24e   :  { %v819_v37 = vor.u32 1.1754944e-38, %v818_v62  ;;  %vm817_vm1 = vcmp.eq.f32.partialorder %v816_v16, 8.507059e+37  ;;  %v2863_v62 = vld [vmem:[#allocation19_spill] sm:$0xff] }
 0x24f   :  { %v2004_v5 = vpop.eup %2003 }
 0x250   :  { %v826_v51 = vadd.f32 1.0, %v2004_v5 }
 0x251   :  { %v2006_v2 = vpop.eup %2005 }
 0x252   :  { %v2008_v12 = vpop.eup %2007  ;;  %v789_v10 = vmul.f32 %v2006_v2, %v787_v43  ;;  %2009 = vrcp.f32 %v826_v51  ;;  %vm794_vm10 = vweird.f32 %v2006_v2  ;;  %vm832_vm3 = vweird.f32 %v826_v51 }
 0x253   :  { %v808_v40 = vmul.f32 %v2008_v12, %v806_v25  ;;  %2011 = vtanh.f32 %v782_v47  ;;  %vm813_vm11 = vweird.f32 %v2008_v12  ;;  %vm795_vm14 = vmor %vm793_vm12, %vm794_vm10  ;;  %v838_v47 = vand.u32 2147483648, %v826_v51 }
 0x254   :  { %v790_v57 = vsub.f32 1.0, %v789_v10  ;;  %vm814_vm15 = vmor %vm812_vm13, %vm813_vm11 }
 0x255   :  { %v809_v56 = vsub.f32 1.0, %v808_v40  ;;  %v839_v40 = vor.u32 1.1754944e-38, %v838_v47 }
 0x256   :  { %v791_v21 = vmul.f32 %v2006_v2, %v790_v57 }
 0x257   :  { %v810_v28 = vmul.f32 %v2008_v12, %v809_v56 }
 0x258   :  { %v2010_v11 = vpop.eup %2009  ;;  %v792_v17 = vadd.f32 %v2006_v2, %v791_v21 }
 0x259   :  { %v811_v63 = vadd.f32 %v2008_v12, %v810_v28  ;;  %v828_v36 = vmul.f32 %v2010_v11, %v826_v51  ;;  %v2012_v7 = vpop.eup %2011  ;;  %vm833_vm2 = vweird.f32 %v2010_v11 }
 0x25a   :  { %v796_v52 = vsel %vm795_vm14, %v2006_v2, %v792_v17  ;;  %v836_v2 = vand.u32 2147483647, %v826_v51  ;;  %vm834_vm4 = vmor %vm832_vm3, %vm833_vm2 }
 0x25b   :  { %v801_v55 = vsel %vm798_vm0, %v800_v8, %v796_v52  ;;  %v815_v14 = vsel %vm814_vm15, %v2008_v12, %v811_v63  ;;  %v829_v26 = vsub.f32 1.0, %v828_v36  ;;  %v2865_v63 = vld [vmem:[#allocation26_spill] sm:$0xff] }
 0x25c   :  { %v820_v9 = vsel %vm817_vm1, %v819_v37, %v815_v14  ;;  %v843_v39 = vmul.f32 %v2012_v7, %v801_v55  ;;  %vm837_vm5 = vcmp.eq.f32.partialorder %v836_v2, 8.507059e+37  ;;  %v2866_v2 = vld [vmem:[#allocation25_spill] sm:$0xff] }
 0x25d   :  { %v842_v41 = vmul.f32 %v820_v9, %v2619_v18  ;;  %v830_v5 = vmul.f32 %v2010_v11, %v829_v26 }
 0x25f   :  { %v2659_v43 = vadd.f32 %v843_v39, %v842_v41  ;;  %v831_v25 = vadd.f32 %v2010_v11, %v830_v5 }
 0x261   :  { %2013 = vtanh.f32 %v2659_v43  ;;  %v835_v10 = vsel %vm834_vm4, %v2010_v11, %v831_v25 }
 0x262   :  { %v840_v57 = vsel %vm837_vm5, %v839_v40, %v835_v10 }
 0x267   :  { %v2014_v12 = vpop.eup %2013 }
 0x268   :  { %v846_v56 = vmul.f32 %v2014_v12, %v840_v57 }
 0x26a   :  { %v854_v49 = vpack.c.bf16 %v846_v56, %v846_v56 }
 0x26c   :  { %863 = vmatmul.bf16.vlgmr.msra.gmra.mxu0 %v854_v49  ;;  %876 = vmatmul.bf16.vlgmr.msra.gmra.mxu1 %v854_v49 }
 0x26d   :  { %889 = vmatmul.bf16.vlgmr.msrb.gmra.mxu2 %v854_v49  ;;  %902 = vmatmul.bf16.vlgmr.msrb.gmra.mxu3 %v854_v49 }
 0x26e   :  { %1109 = vmatpush.bf16.msra.mxu0 %v2285_v24  ;;  %1122 = vmatpush.bf16.msra.mxu1 %v2287_v27 }
 0x26f   :  { %1135 = vmatpush.bf16.msrb.mxu2 %v2289_v31  ;;  %1148 = vmatpush.bf16.msrb.mxu3 %v2283_v23 }
 0x272   :  { %1110 = vmatpush.bf16.msra.mxu0 %v2301_v34  ;;  %1123 = vmatpush.bf16.msra.mxu1 %v2306_v38 }
 0x273   :  { %1136 = vmatpush.bf16.msrb.mxu2 %v2309_v42  ;;  %1149 = vmatpush.bf16.msrb.mxu3 %v2303_v35 }
 0x276   :  { %1111 = vmatpush.bf16.msra.mxu0 %v2313_v46  ;;  %1124 = vmatpush.bf16.msra.mxu1 %v2318_v50 }
 0x277   :  { %1137 = vmatpush.bf16.msrb.mxu2 %v2321_v54  ;;  %1150 = vmatpush.bf16.msrb.mxu3 %v2315_v48 }
 0x27a   :  { %1112 = vmatpush.bf16.msra.mxu0 %v2330_v59  ;;  %1125 = vmatpush.bf16.msra.mxu1 %v2336_v61 }
 0x27b   :  { %1138 = vmatpush.bf16.msrb.mxu2 %v2360_v22  ;;  %1151 = vmatpush.bf16.msrb.mxu3 %v2333_v60 }
 0x27e   :  { %1113 = vmatpush.bf16.msra.mxu0 %v2340_v3  ;;  %1126 = vmatpush.bf16.msra.mxu1 %v2344_v4 }
 0x27f   :  { %1139 = vmatpush.bf16.msrb.mxu2 %v2366_v30  ;;  %1152 = vmatpush.bf16.msrb.mxu3 %v2355_v15 }
 0x282   :  { %1114 = vmatpush.bf16.msra.mxu0 %v2353_v13  ;;  %1127 = vmatpush.bf16.msra.mxu1 %v2358_v20 }
 0x283   :  { %1140 = vmatpush.bf16.msrb.mxu2 %v2398_v58  ;;  %1153 = vmatpush.bf16.msrb.mxu3 %v2363_v29 }
 0x286   :  { %1115 = vmatpush.bf16.msra.mxu0 %v2369_v32  ;;  %1128 = vmatpush.bf16.msra.mxu1 %v2372_v33 }
 0x287   :  { %1141 = vmatpush.bf16.msrb.mxu2 %v2405_v0  ;;  %1154 = vmatpush.bf16.msrb.mxu3 %v2395_v53 }
 0x28a   :  { %1116 = vmatpush.bf16.msra.mxu0 %v2383_v44  ;;  %1129 = vmatpush.bf16.msra.mxu1 %v2386_v45 }
 0x28b   :  { %1142 = vmatpush.bf16.msrb.mxu2 %v2411_v6  ;;  %1155 = vmatpush.bf16.msrb.mxu3 %v2402_v1 }
 0x2e9   :  { %v864_v18 = vpop.f32.mrf.mxu0  ;;  %v877_v51 = vpop.f32.mrf.mxu1 }
 0x2ea   :  { %v907_v21 = vadd.f32 %v864_v18, %v2863_v62  ;;  %v908_v28 = vadd.f32 %v877_v51, %v2864_v19 }
 0x2ec   :  { %v1827_v16 = vmul.f32 -1.442695, %v907_v21  ;;  %v1828_v11 = vmul.f32 -1.442695, %v908_v28 }
 0x2ee   :  { %2015 = vpow2.f32 %v1827_v16 }
 0x2ef   :  { %2017 = vpow2.f32 %v1828_v11 }
 0x2f0   :  { %v890_v17 = vpop.f32.mrf.mxu2  ;;  %v903_v8 = vpop.f32.mrf.mxu3 }
 0x2f1   :  { %v910_v36 = vadd.f32 %v903_v8, %v2865_v63  ;;  %v866_v37 = vpop.f32.mrf.mxu0  ;;  %v879_v52 = vpop.f32.mrf.mxu1  ;;  %v909_v10 = vadd.f32 %v890_v17, %v2866_v2 }
 0x2f3   :  { %v1829_v7 = vmul.f32 -1.442695, %v910_v36 }
 0x2f4   :  { %v2016_v55 = vpop.eup %2015 }
 0x2f5   :  { %v2018_v14 = vpop.eup %2017  ;;  %v914_v26 = vadd.f32 1.0, %v2016_v55  ;;  %2019 = vpow2.f32 %v1829_v7 }
 0x2f6   :  { %v933_v9 = vadd.f32 1.0, %v2018_v14 }
 0x2f7   :  { %2021 = vrcp.f32 %v914_v26  ;;  %v926_v18 = vand.u32 2147483648, %v914_v26  ;;  %v924_v21 = vand.u32 2147483647, %v914_v26  ;;  %vm920_vm8 = vweird.f32 %v914_v26 }
 0x2f8   :  { %2023 = vrcp.f32 %v933_v9  ;;  %v892_v39 = vpop.f32.mrf.mxu2  ;;  %v905_v41 = vpop.f32.mrf.mxu3  ;;  %v945_v51 = vand.u32 2147483648, %v933_v9  ;;  %v943_v28 = vand.u32 2147483647, %v933_v9  ;;  %vm939_vm9 = vweird.f32 %v933_v9 }
 0x2f9   :  { %v927_v17 = vor.u32 1.1754944e-38, %v926_v18  ;;  %vm925_vm12 = vcmp.eq.f32.partialorder %v924_v21, 8.507059e+37  ;;  %v2868_v21 = vld [vmem:[#allocation22_spill] sm:$0xff] }
 0x2fa   :  { %v946_v36 = vor.u32 1.1754944e-38, %v945_v51  ;;  %vm944_vm13 = vcmp.eq.f32.partialorder %v943_v28, 8.507059e+37  ;;  %v2867_v51 = vld [vmem:[#allocation21_spill] sm:$0xff] }
 0x2fb   :  { %v2020_v5 = vpop.eup %2019 }
 0x2fc   :  { %v953_v25 = vadd.f32 1.0, %v2020_v5 }
 0x2fd   :  { %v2022_v47 = vpop.eup %2021 }
 0x2fe   :  { %v2024_v40 = vpop.eup %2023  ;;  %v916_v12 = vmul.f32 %v2022_v47, %v914_v26  ;;  %2025 = vrcp.f32 %v953_v25  ;;  %vm921_vm6 = vweird.f32 %v2022_v47  ;;  %vm959_vm15 = vweird.f32 %v953_v25 }
 0x2ff   :  { %v935_v57 = vmul.f32 %v2024_v40, %v933_v9  ;;  %2027 = vtanh.f32 %v909_v10  ;;  %vm940_vm7 = vweird.f32 %v2024_v40  ;;  %vm922_vm10 = vmor %vm920_vm8, %vm921_vm6  ;;  %v965_v10 = vand.u32 2147483648, %v953_v25 }
 0x300   :  { %v917_v56 = vsub.f32 1.0, %v916_v12  ;;  %vm941_vm11 = vmor %vm939_vm9, %vm940_vm7 }
 0x301   :  { %v936_v49 = vsub.f32 1.0, %v935_v57  ;;  %v966_v57 = vor.u32 1.1754944e-38, %v965_v10 }
 0x302   :  { %v918_v62 = vmul.f32 %v2022_v47, %v917_v56 }
 0x303   :  { %v937_v19 = vmul.f32 %v2024_v40, %v936_v49 }
 0x304   :  { %v2026_v16 = vpop.eup %2025  ;;  %v919_v11 = vadd.f32 %v2022_v47, %v918_v62 }
 0x305   :  { %v938_v8 = vadd.f32 %v2024_v40, %v937_v19  ;;  %v955_v63 = vmul.f32 %v2026_v16, %v953_v25  ;;  %v2028_v52 = vpop.eup %2027  ;;  %vm960_vm14 = vweird.f32 %v2026_v16 }
 0x306   :  { %v923_v37 = vsel %vm922_vm10, %v2022_v47, %v919_v11  ;;  %v963_v47 = vand.u32 2147483647, %v953_v25  ;;  %vm961_vm0 = vmor %vm959_vm15, %vm960_vm14 }
 0x307   :  { %v928_v7 = vsel %vm925_vm12, %v927_v17, %v923_v37  ;;  %v942_v55 = vsel %vm941_vm11, %v2024_v40, %v938_v8  ;;  %v956_v14 = vsub.f32 1.0, %v955_v63  ;;  %v2869_v8 = vld [vmem:[#allocation28_spill] sm:$0xff] }
 0x308   :  { %v947_v39 = vsel %vm944_vm13, %v946_v36, %v942_v55  ;;  %v970_v41 = vmul.f32 %v2028_v52, %v928_v7  ;;  %vm964_vm1 = vcmp.eq.f32.partialorder %v963_v47, 8.507059e+37  ;;  %v2870_v47 = vld [vmem:[#allocation27_spill] sm:$0xff] }
 0x309   :  { %v969_v5 = vmul.f32 %v947_v39, %v2659_v43  ;;  %v957_v2 = vmul.f32 %v2026_v16, %v956_v14 }
 0x30b   :  { %v2699_v26 = vadd.f32 %v970_v41, %v969_v5  ;;  %v958_v9 = vadd.f32 %v2026_v16, %v957_v2 }
 0x30d   :  { %2029 = vtanh.f32 %v2699_v26  ;;  %v962_v12 = vsel %vm961_vm0, %v2026_v16, %v958_v9 }
 0x30e   :  { %v967_v56 = vsel %vm964_vm1, %v966_v57, %v962_v12 }
 0x313   :  { %v2030_v40 = vpop.eup %2029 }
 0x314   :  { %v973_v49 = vmul.f32 %v2030_v40, %v967_v56 }
 0x316   :  { %v981_v18 = vpack.c.bf16 %v973_v49, %v973_v49 }
 0x318   :  { %990 = vmatmul.bf16.vlgmr.msrb.gmra.mxu0 %v981_v18  ;;  %1003 = vmatmul.bf16.vlgmr.msrb.gmra.mxu1 %v981_v18 }
 0x319   :  { %1016 = vmatmul.bf16.vlgmr.msra.gmra.mxu2 %v981_v18  ;;  %1029 = vmatmul.bf16.vlgmr.msra.gmra.mxu3 %v981_v18 }
 0x31a   :  { %1236 = vmatpush.bf16.msrb.mxu0 %v2285_v24  ;;  %1249 = vmatpush.bf16.msrb.mxu1 %v2287_v27 }
 0x31b   :  { %1262 = vmatpush.bf16.msra.mxu2 %v2289_v31  ;;  %1275 = vmatpush.bf16.msra.mxu3 %v2283_v23 }
 0x31e   :  { %1237 = vmatpush.bf16.msrb.mxu0 %v2301_v34  ;;  %1250 = vmatpush.bf16.msrb.mxu1 %v2306_v38 }
 0x31f   :  { %1263 = vmatpush.bf16.msra.mxu2 %v2309_v42  ;;  %1276 = vmatpush.bf16.msra.mxu3 %v2303_v35 }
 0x322   :  { %1238 = vmatpush.bf16.msrb.mxu0 %v2313_v46  ;;  %1251 = vmatpush.bf16.msrb.mxu1 %v2318_v50 }
 0x323   :  { %1264 = vmatpush.bf16.msra.mxu2 %v2321_v54  ;;  %1277 = vmatpush.bf16.msra.mxu3 %v2315_v48 }
 0x326   :  { %1239 = vmatpush.bf16.msrb.mxu0 %v2330_v59  ;;  %1252 = vmatpush.bf16.msrb.mxu1 %v2336_v61 }
 0x327   :  { %1265 = vmatpush.bf16.msra.mxu2 %v2360_v22  ;;  %1278 = vmatpush.bf16.msra.mxu3 %v2333_v60 }
 0x32a   :  { %1240 = vmatpush.bf16.msrb.mxu0 %v2340_v3  ;;  %1253 = vmatpush.bf16.msrb.mxu1 %v2344_v4 }
 0x32b   :  { %1266 = vmatpush.bf16.msra.mxu2 %v2366_v30  ;;  %1279 = vmatpush.bf16.msra.mxu3 %v2355_v15 }
 0x32e   :  { %1241 = vmatpush.bf16.msrb.mxu0 %v2353_v13  ;;  %1254 = vmatpush.bf16.msrb.mxu1 %v2358_v20 }
 0x32f   :  { %1267 = vmatpush.bf16.msra.mxu2 %v2398_v58  ;;  %1280 = vmatpush.bf16.msra.mxu3 %v2363_v29 }
 0x332   :  { %1242 = vmatpush.bf16.msrb.mxu0 %v2369_v32  ;;  %1255 = vmatpush.bf16.msrb.mxu1 %v2372_v33 }
 0x333   :  { %1268 = vmatpush.bf16.msra.mxu2 %v2405_v0  ;;  %1281 = vmatpush.bf16.msra.mxu3 %v2395_v53 }
 0x336   :  { %1243 = vmatpush.bf16.msrb.mxu0 %v2383_v44  ;;  %1256 = vmatpush.bf16.msrb.mxu1 %v2386_v45 }
 0x337   :  { %1269 = vmatpush.bf16.msra.mxu2 %v2411_v6  ;;  %1282 = vmatpush.bf16.msra.mxu3 %v2402_v1 }
 0x395   :  { %v991_v43 = vpop.f32.mrf.mxu0  ;;  %v1004_v25 = vpop.f32.mrf.mxu1 }
 0x396   :  { %v1034_v62 = vadd.f32 %v991_v43, %v2867_v51  ;;  %v1035_v19 = vadd.f32 %v1004_v25, %v2868_v21 }
 0x398   :  { %v1830_v28 = vmul.f32 -1.442695, %v1034_v62  ;;  %v1831_v16 = vmul.f32 -1.442695, %v1035_v19 }
 0x39a   :  { %2031 = vpow2.f32 %v1830_v28 }
 0x39b   :  { %2033 = vpow2.f32 %v1831_v16 }
 0x39c   :  { %v1017_v11 = vpop.f32.mrf.mxu2  ;;  %v1030_v17 = vpop.f32.mrf.mxu3 }
 0x39d   :  { %v1037_v63 = vadd.f32 %v1030_v17, %v2869_v8  ;;  %v993_v36 = vpop.f32.mrf.mxu0  ;;  %v1006_v37 = vpop.f32.mrf.mxu1  ;;  %v1036_v12 = vadd.f32 %v1017_v11, %v2870_v47 }
 0x39f   :  { %v1832_v52 = vmul.f32 -1.442695, %v1037_v63 }
 0x3a0   :  { %v2032_v7 = vpop.eup %2031 }
 0x3a1   :  { %v2034_v55 = vpop.eup %2033  ;;  %v1041_v14 = vadd.f32 1.0, %v2032_v7  ;;  %2035 = vpow2.f32 %v1832_v52 }
 0x3a2   :  { %v1060_v39 = vadd.f32 1.0, %v2034_v55 }
 0x3a3   :  { %2037 = vrcp.f32 %v1041_v14  ;;  %v1053_v43 = vand.u32 2147483648, %v1041_v14  ;;  %v1051_v62 = vand.u32 2147483647, %v1041_v14  ;;  %vm1047_vm4 = vweird.f32 %v1041_v14 }
 0x3a4   :  { %2039 = vrcp.f32 %v1060_v39  ;;  %v1019_v41 = vpop.f32.mrf.mxu2  ;;  %v1032_v5 = vpop.f32.mrf.mxu3  ;;  %v1072_v25 = vand.u32 2147483648, %v1060_v39  ;;  %v1070_v19 = vand.u32 2147483647, %v1060_v39  ;;  %vm1066_vm5 = vweird.f32 %v1060_v39 }
 0x3a5   :  { %v1054_v11 = vor.u32 1.1754944e-38, %v1053_v43  ;;  %vm1052_vm8 = vcmp.eq.f32.partialorder %v1051_v62, 8.507059e+37 }
 0x3a6   :  { %v1073_v63 = vor.u32 1.1754944e-38, %v1072_v25  ;;  %vm1071_vm9 = vcmp.eq.f32.partialorder %v1070_v19, 8.507059e+37 }
 0x3a7   :  { %v2036_v2 = vpop.eup %2035 }
 0x3a8   :  { %v1080_v9 = vadd.f32 1.0, %v2036_v2 }
 0x3a9   :  { %v2038_v10 = vpop.eup %2037 }
 0x3aa   :  { %v2040_v57 = vpop.eup %2039  ;;  %v1043_v40 = vmul.f32 %v2038_v10, %v1041_v14  ;;  %2041 = vrcp.f32 %v1080_v9  ;;  %vm1048_vm2 = vweird.f32 %v2038_v10  ;;  %vm1086_vm11 = vweird.f32 %v1080_v9 }
 0x3ab   :  { %v1062_v56 = vmul.f32 %v2040_v57, %v1060_v39  ;;  %2043 = vtanh.f32 %v1036_v12  ;;  %vm1067_vm3 = vweird.f32 %v2040_v57  ;;  %vm1049_vm6 = vmor %vm1047_vm4, %vm1048_vm2  ;;  %v1092_v12 = vand.u32 2147483648, %v1080_v9 }
 0x3ac   :  { %v1044_v49 = vsub.f32 1.0, %v1043_v40  ;;  %vm1068_vm7 = vmor %vm1066_vm5, %vm1067_vm3 }
 0x3ad   :  { %v1063_v18 = vsub.f32 1.0, %v1062_v56  ;;  %v1093_v56 = vor.u32 1.1754944e-38, %v1092_v12 }
 0x3ae   :  { %v1045_v51 = vmul.f32 %v2038_v10, %v1044_v49 }
 0x3af   :  { %v1064_v21 = vmul.f32 %v2040_v57, %v1063_v18 }
 0x3b0   :  { %v2042_v28 = vpop.eup %2041  ;;  %v1046_v16 = vadd.f32 %v2038_v10, %v1045_v51 }
 0x3b1   :  { %v1065_v17 = vadd.f32 %v2040_v57, %v1064_v21  ;;  %v1082_v8 = vmul.f32 %v2042_v28, %v1080_v9  ;;  %v2044_v37 = vpop.eup %2043  ;;  %vm1087_vm10 = vweird.f32 %v2042_v28 }
 0x3b2   :  { %v1050_v36 = vsel %vm1049_vm6, %v2038_v10, %v1046_v16  ;;  %v1090_v10 = vand.u32 2147483647, %v1080_v9  ;;  %vm1088_vm12 = vmor %vm1086_vm11, %vm1087_vm10 }
 0x3b3   :  { %v1055_v52 = vsel %vm1052_vm8, %v1054_v11, %v1050_v36  ;;  %v1069_v7 = vsel %vm1068_vm7, %v2040_v57, %v1065_v17  ;;  %v1083_v55 = vsub.f32 1.0, %v1082_v8 }
 0x3b4   :  { %v1074_v41 = vsel %vm1071_vm9, %v1073_v63, %v1069_v7  ;;  %v1097_v5 = vmul.f32 %v2044_v37, %v1055_v52  ;;  %vm1091_vm13 = vcmp.eq.f32.partialorder %v1090_v10, 8.507059e+37 }
 0x3b5   :  { %v1096_v2 = vmul.f32 %v1074_v41, %v2699_v26  ;;  %v1084_v47 = vmul.f32 %v2042_v28, %v1083_v55 }
 0x3b7   :  { %v2739_v14 = vadd.f32 %v1097_v5, %v1096_v2  ;;  %v1085_v39 = vadd.f32 %v2042_v28, %v1084_v47 }
 0x3b9   :  { %2045 = vtanh.f32 %v2739_v14  ;;  %v1089_v40 = vsel %vm1088_vm12, %v2042_v28, %v1085_v39 }
 0x3ba   :  { %v1094_v49 = vsel %vm1091_vm13, %v1093_v56, %v1089_v40 }
 0x3bf   :  { %v2046_v57 = vpop.eup %2045 }
 0x3c0   :  { %v1100_v18 = vmul.f32 %v2046_v57, %v1094_v49 }
 0x3c2   :  { %v1108_v43 = vpack.c.bf16 %v1100_v18, %v1100_v18 }
 0x3c4   :  { %1117 = vmatmul.bf16.vlgmr.msra.gmra.mxu0 %v1108_v43  ;;  %1130 = vmatmul.bf16.vlgmr.msra.gmra.mxu1 %v1108_v43 }
 0x3c5   :  { %1143 = vmatmul.bf16.vlgmr.msrb.gmra.mxu2 %v1108_v43  ;;  %1156 = vmatmul.bf16.vlgmr.msrb.gmra.mxu3 %v1108_v43 }
 0x3c6   :  { %1363 = vmatpush.bf16.msra.mxu0 %v2285_v24  ;;  %1376 = vmatpush.bf16.msra.mxu1 %v2287_v27  ;;  %v2871_v27 = vld [vmem:[#allocation23_spill] sm:$0xff] }
 0x3c7   :  { %1389 = vmatpush.bf16.msrb.mxu2 %v2289_v31  ;;  %1402 = vmatpush.bf16.msrb.mxu3 %v2283_v23 }
 0x3ca   :  { %1364 = vmatpush.bf16.msra.mxu0 %v2301_v34  ;;  %1377 = vmatpush.bf16.msra.mxu1 %v2306_v38  ;;  %v2872_v34 = vld [vmem:[#allocation24_spill] sm:$0xff] }
 0x3cb   :  { %1390 = vmatpush.bf16.msrb.mxu2 %v2309_v42  ;;  %1403 = vmatpush.bf16.msrb.mxu3 %v2303_v35 }
 0x3ce   :  { %1365 = vmatpush.bf16.msra.mxu0 %v2313_v46  ;;  %1378 = vmatpush.bf16.msra.mxu1 %v2318_v50  ;;  %v2873_v50 = vld [vmem:[#allocation30_spill] sm:$0xff] }
 0x3cf   :  { %1391 = vmatpush.bf16.msrb.mxu2 %v2321_v54  ;;  %1404 = vmatpush.bf16.msrb.mxu3 %v2315_v48 }
 0x3d2   :  { %1366 = vmatpush.bf16.msra.mxu0 %v2330_v59  ;;  %1379 = vmatpush.bf16.msra.mxu1 %v2336_v61 }
 0x3d3   :  { %1392 = vmatpush.bf16.msrb.mxu2 %v2360_v22  ;;  %1405 = vmatpush.bf16.msrb.mxu3 %v2333_v60 }
 0x3d6   :  { %1367 = vmatpush.bf16.msra.mxu0 %v2340_v3  ;;  %1380 = vmatpush.bf16.msra.mxu1 %v2344_v4 }
 0x3d7   :  { %1393 = vmatpush.bf16.msrb.mxu2 %v2366_v30  ;;  %1406 = vmatpush.bf16.msrb.mxu3 %v2355_v15 }
 0x3da   :  { %1368 = vmatpush.bf16.msra.mxu0 %v2353_v13  ;;  %1381 = vmatpush.bf16.msra.mxu1 %v2358_v20 }
 0x3db   :  { %1394 = vmatpush.bf16.msrb.mxu2 %v2398_v58  ;;  %1407 = vmatpush.bf16.msrb.mxu3 %v2363_v29 }
 0x3de   :  { %1369 = vmatpush.bf16.msra.mxu0 %v2369_v32  ;;  %1382 = vmatpush.bf16.msra.mxu1 %v2372_v33  ;;  %v2874_v33 = vld [vmem:[#allocation29_spill] sm:$0xff] }
 0x3df   :  { %1395 = vmatpush.bf16.msrb.mxu2 %v2405_v0  ;;  %1408 = vmatpush.bf16.msrb.mxu3 %v2395_v53 }
 0x3e2   :  { %1370 = vmatpush.bf16.msra.mxu0 %v2383_v44  ;;  %1383 = vmatpush.bf16.msra.mxu1 %v2386_v45 }
 0x3e3   :  { %1396 = vmatpush.bf16.msrb.mxu2 %v2411_v6  ;;  %1409 = vmatpush.bf16.msrb.mxu3 %v2402_v1 }
 0x441   :  { %v1118_v23 = vpop.f32.mrf.mxu0  ;;  %v1131_v24 = vpop.f32.mrf.mxu1 }
 0x442   :  { %v1161_v31 = vadd.f32 %v1118_v23, %v2871_v27  ;;  %v1162_v35 = vadd.f32 %v1131_v24, %v2872_v34  ;;  %v2875_v23 = vld [vmem:[#allocation15_spill] sm:$0xff]  ;;  %v2876_v27 = vld [vmem:[#allocation16_spill] sm:$0xff] }
 0x444   :  { %v1833_v38 = vmul.f32 -1.442695, %v1161_v31  ;;  %v1834_v42 = vmul.f32 -1.442695, %v1162_v35 }
 0x446   :  { %2047 = vpow2.f32 %v1833_v38 }
 0x447   :  { %2049 = vpow2.f32 %v1834_v42 }
 0x448   :  { %v1144_v46 = vpop.f32.mrf.mxu2  ;;  %v1157_v48 = vpop.f32.mrf.mxu3 }
 0x449   :  { %v1164_v54 = vadd.f32 %v1157_v48, %v2873_v50  ;;  %v1120_v59 = vpop.f32.mrf.mxu0  ;;  %v1133_v60 = vpop.f32.mrf.mxu1  ;;  %v1163_v44 = vadd.f32 %v1144_v46, %v2874_v33  ;;  %v2877_v46 = vld [vmem:[#allocation32_spill] sm:$0xff] }
 0x44b   :  { %v1835_v61 = vmul.f32 -1.442695, %v1164_v54 }
 0x44c   :  { %v2048_v3 = vpop.eup %2047 }
 0x44d   :  { %v2050_v4 = vpop.eup %2049  ;;  %v1168_v13 = vadd.f32 1.0, %v2048_v3  ;;  %2051 = vpow2.f32 %v1835_v61 }
 0x44e   :  { %v1187_v15 = vadd.f32 1.0, %v2050_v4 }
 0x44f   :  { %2053 = vrcp.f32 %v1168_v13  ;;  %v1180_v6 = vand.u32 2147483648, %v1168_v13  ;;  %v1178_v25 = vand.u32 2147483647, %v1168_v13  ;;  %vm1174_vm0 = vweird.f32 %v1168_v13 }
 0x450   :  { %2055 = vrcp.f32 %v1187_v15  ;;  %v1146_v20 = vpop.f32.mrf.mxu2  ;;  %v1159_v22 = vpop.f32.mrf.mxu3  ;;  %v1199_v26 = vand.u32 2147483648, %v1187_v15  ;;  %v1197_v62 = vand.u32 2147483647, %v1187_v15  ;;  %vm1193_vm1 = vweird.f32 %v1187_v15 }
 0x451   :  { %v1181_v28 = vor.u32 1.1754944e-38, %v1180_v6  ;;  %vm1179_vm4 = vcmp.eq.f32.partialorder %v1178_v25, 8.507059e+37 }
 0x452   :  { %v1200_v17 = vor.u32 1.1754944e-38, %v1199_v26  ;;  %vm1198_vm5 = vcmp.eq.f32.partialorder %v1197_v62, 8.507059e+37 }
 0x453   :  { %v2052_v29 = vpop.eup %2051 }
 0x454   :  { %v1207_v30 = vadd.f32 1.0, %v2052_v29 }
 0x455   :  { %v2054_v32 = vpop.eup %2053 }
 0x456   :  { %v2056_v45 = vpop.eup %2055  ;;  %v1170_v53 = vmul.f32 %v2054_v32, %v1168_v13  ;;  %2057 = vrcp.f32 %v1207_v30  ;;  %vm1175_vm14 = vweird.f32 %v2054_v32  ;;  %v1219_v39 = vand.u32 2147483648, %v1207_v30 }
 0x457   :  { %v1189_v58 = vmul.f32 %v2056_v45, %v1187_v15  ;;  %2059 = vtanh.f32 %v1163_v44  ;;  %vm1194_vm15 = vweird.f32 %v2056_v45  ;;  %vm1176_vm2 = vmor %vm1174_vm0, %vm1175_vm14  ;;  %vm1213_vm7 = vweird.f32 %v1207_v30 }
 0x458   :  { %v1171_v1 = vsub.f32 1.0, %v1170_v53  ;;  %vm1195_vm3 = vmor %vm1193_vm1, %vm1194_vm15  ;;  %v1217_v12 = vand.u32 2147483647, %v1207_v30  ;;  %v1220_v40 = vor.u32 1.1754944e-38, %v1219_v39 }
 0x459   :  { %v1190_v0 = vsub.f32 1.0, %v1189_v58 }
 0x45a   :  { %v1172_v9 = vmul.f32 %v2054_v32, %v1171_v1  ;;  %vm1218_vm9 = vcmp.eq.f32.partialorder %v1217_v12, 8.507059e+37 }
 0x45b   :  { %v1191_v51 = vmul.f32 %v2056_v45, %v1190_v0 }
 0x45c   :  { %v2058_v21 = vpop.eup %2057  ;;  %v1173_v19 = vadd.f32 %v2054_v32, %v1172_v9 }
 0x45d   :  { %v1192_v16 = vadd.f32 %v2056_v45, %v1191_v51  ;;  %v1209_v11 = vmul.f32 %v2058_v21, %v1207_v30  ;;  %v2060_v63 = vpop.eup %2059  ;;  %vm1214_vm6 = vweird.f32 %v2058_v21  ;;  %v2878_v30 = vld [vmem:[#allocation31_spill] sm:$0xff] }
 0x45e   :  { %v1177_v8 = vsel %vm1176_vm2, %v2054_v32, %v1173_v19  ;;  %vm1215_vm8 = vmor %vm1213_vm7, %vm1214_vm6 }
 0x45f   :  { %v1182_v36 = vsel %vm1179_vm4, %v1181_v28, %v1177_v8  ;;  %v1196_v37 = vsel %vm1195_vm3, %v2056_v45, %v1192_v16  ;;  %v1210_v52 = vsub.f32 1.0, %v1209_v11 }
 0x460   :  { %v1201_v7 = vsel %vm1198_vm5, %v1200_v17, %v1196_v37  ;;  %v1224_v55 = vmul.f32 %v2060_v63, %v1182_v36 }
 0x461   :  { %v1223_v41 = vmul.f32 %v1201_v7, %v2739_v14  ;;  %v1211_v5 = vmul.f32 %v2058_v21, %v1210_v52 }
 0x463   :  { %v2779_v2 = vadd.f32 %v1224_v55, %v1223_v41  ;;  %v1212_v47 = vadd.f32 %v2058_v21, %v1211_v5 }
 0x465   :  { %2061 = vtanh.f32 %v2779_v2  ;;  %v1216_v10 = vsel %vm1215_vm8, %v2058_v21, %v1212_v47 }
 0x466   :  { %v1221_v57 = vsel %vm1218_vm9, %v1220_v40, %v1216_v10 }
 0x46b   :  { %v2062_v56 = vpop.eup %2061 }
 0x46c   :  { %v1227_v49 = vmul.f32 %v2062_v56, %v1221_v57 }
 0x46e   :  { %v1235_v18 = vpack.c.bf16 %v1227_v49, %v1227_v49 }
 0x470   :  { %1244 = vmatmul.bf16.vlgmr.msrb.gmra.mxu0 %v1235_v18  ;;  %1257 = vmatmul.bf16.vlgmr.msrb.gmra.mxu1 %v1235_v18 }
 0x471   :  { %1270 = vmatmul.bf16.vlgmr.msra.gmra.mxu2 %v1235_v18  ;;  %1283 = vmatmul.bf16.vlgmr.msra.gmra.mxu3 %v1235_v18  ;;  %v1944_v18 = vld [vmem:[%s2834_s4 + $0x30] sm:$0xff] }
 0x4ed   :  { %v1245_v14 = vpop.f32.mrf.mxu0  ;;  %v1258_v43 = vpop.f32.mrf.mxu1 }
 0x4ee   :  { %v1288_v24 = vadd.f32 %v1245_v14, %v2875_v23  ;;  %v1289_v31 = vadd.f32 %v1258_v43, %v2876_v27  ;;  %v1943_v14 = vld [vmem:[%s2834_s4 + $0x28] sm:$0xff]  ;;  %v1942_v43 = vld [vmem:[%s2834_s4 + $0x20] sm:$0xff]  ;;  %v1941_v23 = vld [vmem:[%s2834_s4 + $0x18] sm:$0xff] }
 0x4ef   :  { %v2880_v27 = vld [vmem:[#allocation17_spill] sm:$0xff] }
 0x4f0   :  { %v1836_v34 = vmul.f32 -1.442695, %v1288_v24  ;;  %v1837_v35 = vmul.f32 -1.442695, %v1289_v31  ;;  %v2879_v24 = vld [vmem:[#allocation13_spill] sm:$0xff] }
 0x4f1   :  { %v154_v31 = vadd.f32 %v2880_v27, %v2879_v24  ;;  %v1948_v27 = vld [vmem:[#allocation8 + $0x10] sm:$0xff] }
 0x4f2   :  { %2063 = vpow2.f32 %v1836_v34  ;;  %v2881_v34 = vld [vmem:[#allocation14_spill] sm:$0xff] }
 0x4f3   :  { %2065 = vpow2.f32 %v1837_v35  ;;  %v2882_v35 = vld [vmem:[#allocation18_spill] sm:$0xff] }
 0x4f4   :  { %v1271_v38 = vpop.f32.mrf.mxu2  ;;  %v1284_v42 = vpop.f32.mrf.mxu3 }
 0x4f5   :  { %v1291_v48 = vadd.f32 %v1284_v42, %v2877_v46  ;;  %v1247_v50 = vpop.f32.mrf.mxu0  ;;  %v1260_v54 = vpop.f32.mrf.mxu1  ;;  %v1290_v32 = vadd.f32 %v1271_v38, %v2878_v30  ;;  %v183_v38 = vadd.f32 %v2882_v35, %v2881_v34 }
 0x4f6   :  { %v1940_v54 = vld [vmem:[%s2834_s4 + $0x10] sm:$0xff] }
 0x4f7   :  { %v1838_v59 = vmul.f32 -1.442695, %v1291_v48 }
 0x4f8   :  { %v2064_v60 = vpop.eup %2063 }
 0x4f9   :  { %v2066_v61 = vpop.eup %2065  ;;  %v1295_v3 = vadd.f32 1.0, %v2064_v60  ;;  %2067 = vpow2.f32 %v1838_v59 }
 0x4fa   :  { %v1314_v4 = vadd.f32 1.0, %v2066_v61  ;;  %v1939_v61 = vld [vmem:[%s2834_s4 + $0x8] sm:$0xff] }
 0x4fb   :  { %2069 = vrcp.f32 %v1295_v3  ;;  %v1307_v1 = vand.u32 2147483648, %v1295_v3  ;;  %v1305_v26 = vand.u32 2147483647, %v1295_v3  ;;  %vm1301_vm12 = vweird.f32 %v1295_v3 }
 0x4fc   :  { %2071 = vrcp.f32 %v1314_v4  ;;  %v1273_v13 = vpop.f32.mrf.mxu2  ;;  %v1286_v15 = vpop.f32.mrf.mxu3  ;;  %v1326_v0 = vand.u32 2147483648, %v1314_v4  ;;  %v1324_v25 = vand.u32 2147483647, %v1314_v4  ;;  %vm1320_vm13 = vweird.f32 %v1314_v4 }
 0x4fd   :  { %v1308_v21 = vor.u32 1.1754944e-38, %v1307_v1  ;;  %vm1306_vm0 = vcmp.eq.f32.partialorder %v1305_v26, 8.507059e+37  ;;  %v2883_v13 = vld [vmem:[#allocation34_spill] sm:$0xff]  ;;  %v1953_v1 = vld [vmem:[#allocation8 + $0x38] sm:$0xff] }
 0x4fe   :  { %v1327_v16 = vor.u32 1.1754944e-38, %v1326_v0  ;;  %vm1325_vm1 = vcmp.eq.f32.partialorder %v1324_v25, 8.507059e+37  ;;  %1634 = vmatpush.bf16.msrb.mxu1 %v1953_v1  ;;  %v1952_v0 = vld [vmem:[#allocation8 + $0x30] sm:$0xff]  ;;  %v2884_v25 = vld [vmem:[#allocation33_spill] sm:$0xff] }
 0x4ff   :  { %v2068_v20 = vpop.eup %2067 }
 0x500   :  { %v1334_v22 = vadd.f32 1.0, %v2068_v20 }
 0x501   :  { %v2070_v29 = vpop.eup %2069 }
 0x502   :  { %v2072_v33 = vpop.eup %2071  ;;  %v1297_v44 = vmul.f32 %v2070_v29, %v1295_v3  ;;  %2073 = vrcp.f32 %v1334_v22  ;;  %vm1302_vm10 = vweird.f32 %v2070_v29  ;;  %v1346_v47 = vand.u32 2147483648, %v1334_v22  ;;  %1635 = vmatpush.bf16.msrb.mxu1 %v1952_v0 }
 0x503   :  { %v1316_v45 = vmul.f32 %v2072_v33, %v1314_v4  ;;  %2075 = vtanh.f32 %v1290_v32  ;;  %vm1321_vm11 = vweird.f32 %v2072_v33  ;;  %vm1303_vm14 = vmor %vm1301_vm12, %vm1302_vm10  ;;  %vm1340_vm3 = vweird.f32 %v1334_v22 }
 0x504   :  { %v1298_v53 = vsub.f32 1.0, %v1297_v44  ;;  %vm1322_vm15 = vmor %vm1320_vm13, %vm1321_vm11  ;;  %v1344_v39 = vand.u32 2147483647, %v1334_v22  ;;  %v1347_v10 = vor.u32 1.1754944e-38, %v1346_v47 }
 0x505   :  { %v1317_v58 = vsub.f32 1.0, %v1316_v45 }
 0x506   :  { %v1299_v6 = vmul.f32 %v2070_v29, %v1298_v53  ;;  %vm1345_vm5 = vcmp.eq.f32.partialorder %v1344_v39, 8.507059e+37 }
 0x507   :  { %v1318_v9 = vmul.f32 %v2072_v33, %v1317_v58 }
 0x508   :  { %v2074_v51 = vpop.eup %2073  ;;  %v1300_v62 = vadd.f32 %v2070_v29, %v1299_v6 }
 0x509   :  { %v1319_v19 = vadd.f32 %v2072_v33, %v1318_v9  ;;  %v1336_v28 = vmul.f32 %v2074_v51, %v1334_v22  ;;  %v2076_v17 = vpop.eup %2075  ;;  %vm1341_vm2 = vweird.f32 %v2074_v51 }
 0x50a   :  { %v1304_v11 = vsel %vm1303_vm14, %v2070_v29, %v1300_v62  ;;  %vm1342_vm4 = vmor %vm1340_vm3, %vm1341_vm2  ;;  %v1938_v29 = vld [vmem:[%s2834_s4] sm:$0xff] }
 0x50b   :  { %v1309_v8 = vsel %vm1306_vm0, %v1308_v21, %v1304_v11  ;;  %v1323_v63 = vsel %vm1322_vm15, %v2072_v33, %v1319_v19  ;;  %v1337_v36 = vsub.f32 1.0, %v1336_v28  ;;  %v1951_v19 = vld [vmem:[#allocation8 + $0x28] sm:$0xff] }
 0x50c   :  { %v1328_v37 = vsel %vm1325_vm1, %v1327_v16, %v1323_v63  ;;  %v1351_v52 = vmul.f32 %v2076_v17, %v1309_v8  ;;  %1636 = vmatpush.bf16.msrb.mxu1 %v1951_v19 }
 0x50d   :  { %v1350_v7 = vmul.f32 %v1328_v37, %v2779_v2  ;;  %v1338_v55 = vmul.f32 %v2074_v51, %v1337_v36  ;;  %v1945_v2 = vld [vmem:[%s2834_s4 + $0x38] sm:$0xff]  ;;  %v1950_v37 = vld [vmem:[#allocation8 + $0x20] sm:$0xff] }
 0x50e   :  { %1551 = vmatpush.bf16.msrb.mxu0 %v1945_v2 }
 0x50f   :  { %v2787_v41 = vadd.f32 %v1351_v52, %v1350_v7  ;;  %v1339_v5 = vadd.f32 %v2074_v51, %v1338_v55 }
 0x510   :  { %1637 = vmatpush.bf16.msrb.mxu1 %v1950_v37 }
 0x511   :  { %2077 = vtanh.f32 %v2787_v41  ;;  %v1343_v12 = vsel %vm1342_vm4, %v2074_v51, %v1339_v5 }
 0x512   :  { %v1348_v56 = vsel %vm1345_vm5, %v1347_v10, %v1343_v12  ;;  %1552 = vmatpush.bf16.msrb.mxu0 %v1944_v18 }
 0x516   :  { %1553 = vmatpush.bf16.msrb.mxu0 %v1943_v14 }
 0x517   :  { %v2078_v40 = vpop.eup %2077 }
 0x518   :  { %v1354_v57 = vmul.f32 %v2078_v40, %v1348_v56  ;;  %v1949_v56 = vld [vmem:[#allocation8 + $0x18] sm:$0xff] }
 0x519   :  { %1638 = vmatpush.bf16.msrb.mxu1 %v1949_v56 }
 0x51a   :  { %v1362_v49 = vpack.c.bf16 %v1354_v57, %v1354_v57  ;;  %1554 = vmatpush.bf16.msrb.mxu0 %v1942_v43 }
 0x51c   :  { %1371 = vmatmul.bf16.vlgmr.msra.gmra.mxu0 %v1362_v49  ;;  %1384 = vmatmul.bf16.vlgmr.msra.gmra.mxu1 %v1362_v49 }
 0x51d   :  { %1397 = vmatmul.bf16.vlgmr.msrb.gmra.mxu2 %v1362_v49  ;;  %1410 = vmatmul.bf16.vlgmr.msrb.gmra.mxu3 %v1362_v49 }
 0x51e   :  { %1555 = vmatpush.bf16.msrb.mxu0 %v1941_v23  ;;  %1639 = vmatpush.bf16.msrb.mxu1 %v1948_v27 }
 0x522   :  { %1556 = vmatpush.bf16.msrb.mxu0 %v1940_v54 }
 0x526   :  { %1557 = vmatpush.bf16.msrb.mxu0 %v1939_v61  ;;  %v1965_v61 = vld [vmem:[%s2835_s5] ss:$0 sm:$0xff] }
 0x52a   :  { %1558 = vmatpush.bf16.msrb.mxu0 %v1938_v29 }
 0x599   :  { %v1372_v42 = vpop.f32.mrf.mxu0  ;;  %v1385_v46 = vpop.f32.mrf.mxu1 }
 0x59a   :  { %v1415_v48 = vadd.f32 %v1372_v42, %v154_v31  ;;  %v1416_v50 = vadd.f32 %v1385_v46, %v183_v38 }
 0x59c   :  { %v1839_v59 = vmul.f32 -1.442695, %v1415_v48  ;;  %v1840_v60 = vmul.f32 -1.442695, %v1416_v50 }
 0x59e   :  { %2079 = vpow2.f32 %v1839_v59 }
 0x59f   :  { %2081 = vpow2.f32 %v1840_v60  ;;  %v1946_v60 = vld [vmem:[#allocation8] sm:$0xff] }
 0x5a0   :  { %v1398_v3 = vpop.f32.mrf.mxu2  ;;  %v1411_v4 = vpop.f32.mrf.mxu3 }
 0x5a1   :  { %v1418_v15 = vadd.f32 %v1411_v4, %v2883_v13  ;;  %v1374_v20 = vpop.f32.mrf.mxu0  ;;  %v1387_v22 = vpop.f32.mrf.mxu1  ;;  %v1417_v51 = vadd.f32 %v1398_v3, %v2884_v25 }
 0x5a2   :  { %v1966_v22 = vld [vmem:[%s2837_s7] ss:$0 sm:$0xff] }
 0x5a3   :  { %v1841_v30 = vmul.f32 -1.442695, %v1418_v15 }
 0x5a4   :  { %v2080_v32 = vpop.eup %2079 }
 0x5a5   :  { %v2082_v33 = vpop.eup %2081  ;;  %v1422_v44 = vadd.f32 1.0, %v2080_v32  ;;  %2083 = vpow2.f32 %v1841_v30 }
 0x5a6   :  { %v1441_v45 = vadd.f32 1.0, %v2082_v33 }
 0x5a7   :  { %2085 = vrcp.f32 %v1422_v44  ;;  %v1434_v17 = vand.u32 2147483648, %v1422_v44  ;;  %v1432_v36 = vand.u32 2147483647, %v1422_v44  ;;  %vm1428_vm8 = vweird.f32 %v1422_v44 }
 0x5a8   :  { %2087 = vrcp.f32 %v1441_v45  ;;  %v1400_v53 = vpop.f32.mrf.mxu2  ;;  %v1413_v58 = vpop.f32.mrf.mxu3  ;;  %v1453_v8 = vand.u32 2147483648, %v1441_v45  ;;  %v1451_v7 = vand.u32 2147483647, %v1441_v45  ;;  %vm1447_vm9 = vweird.f32 %v1441_v45 }
 0x5a9   :  { %v1435_v47 = vor.u32 1.1754944e-38, %v1434_v17  ;;  %vm1433_vm12 = vcmp.eq.f32.partialorder %v1432_v36, 8.507059e+37 }
 0x5aa   :  { %v1454_v10 = vor.u32 1.1754944e-38, %v1453_v8  ;;  %vm1452_vm13 = vcmp.eq.f32.partialorder %v1451_v7, 8.507059e+37 }
 0x5ab   :  { %v2084_v6 = vpop.eup %2083 }
 0x5ac   :  { %v1461_v26 = vadd.f32 1.0, %v2084_v6 }
 0x5ad   :  { %v2086_v9 = vpop.eup %2085 }
 0x5ae   :  { %v2088_v62 = vpop.eup %2087  ;;  %v1424_v21 = vmul.f32 %v2086_v9, %v1422_v44  ;;  %2089 = vrcp.f32 %v1461_v26  ;;  %vm1429_vm6 = vweird.f32 %v2086_v9  ;;  %v1473_v35 = vand.u32 2147483648, %v1461_v26 }
 0x5af   :  { %v1443_v28 = vmul.f32 %v2088_v62, %v1441_v45  ;;  %2091 = vtanh.f32 %v1417_v51  ;;  %vm1448_vm7 = vweird.f32 %v2088_v62  ;;  %vm1430_vm10 = vmor %vm1428_vm8, %vm1429_vm6  ;;  %vm1467_vm15 = vweird.f32 %v1461_v26 }
 0x5b0   :  { %v1425_v16 = vsub.f32 1.0, %v1424_v21  ;;  %vm1449_vm11 = vmor %vm1447_vm9, %vm1448_vm7  ;;  %v1471_v38 = vand.u32 2147483647, %v1461_v26  ;;  %v1474_v46 = vor.u32 1.1754944e-38, %v1473_v35 }
 0x5b1   :  { %v1444_v11 = vsub.f32 1.0, %v1443_v28 }
 0x5b2   :  { %v1426_v63 = vmul.f32 %v2086_v9, %v1425_v16  ;;  %vm1472_vm1 = vcmp.eq.f32.partialorder %v1471_v38, 8.507059e+37 }
 0x5b3   :  { %v1445_v52 = vmul.f32 %v2088_v62, %v1444_v11 }
 0x5b4   :  { %v2090_v55 = vpop.eup %2089  ;;  %v1427_v5 = vadd.f32 %v2086_v9, %v1426_v63 }
 0x5b5   :  { %v1446_v39 = vadd.f32 %v2088_v62, %v1445_v52  ;;  %v1463_v12 = vmul.f32 %v2090_v55, %v1461_v26  ;;  %v2092_v57 = vpop.eup %2091  ;;  %vm1468_vm14 = vweird.f32 %v2090_v55 }
 0x5b6   :  { %v1431_v40 = vsel %vm1430_vm10, %v2086_v9, %v1427_v5  ;;  %vm1469_vm0 = vmor %vm1467_vm15, %vm1468_vm14 }
 0x5b7   :  { %v1436_v49 = vsel %vm1433_vm12, %v1435_v47, %v1431_v40  ;;  %v1450_v2 = vsel %vm1449_vm11, %v2088_v62, %v1446_v39  ;;  %v1464_v18 = vsub.f32 1.0, %v1463_v12 }
 0x5b8   :  { %v1455_v14 = vsel %vm1452_vm13, %v1454_v10, %v1450_v2  ;;  %v1478_v43 = vmul.f32 %v2092_v57, %v1436_v49 }
 0x5b9   :  { %v1477_v23 = vmul.f32 %v1455_v14, %v2787_v41  ;;  %v1465_v24 = vmul.f32 %v2090_v55, %v1464_v18  ;;  %v1947_v41 = vld [vmem:[#allocation8 + $0x8] sm:$0xff] }
 0x5ba   :  { %1640 = vmatpush.bf16.msrb.mxu1 %v1947_v41 }
 0x5bb   :  { %v1479_v31 = vadd.f32 %v1478_v43, %v1477_v23  ;;  %v1466_v34 = vadd.f32 %v2090_v55, %v1465_v24 }
 0x5bd   :  { %2093 = vtanh.f32 %v1479_v31  ;;  %v1470_v42 = vsel %vm1469_vm0, %v2090_v55, %v1466_v34 }
 0x5be   :  { %v1475_v50 = vsel %vm1472_vm1, %v1474_v46, %v1470_v42  ;;  %1641 = vmatpush.bf16.msrb.mxu1 %v1946_v60 }
 0x5c3   :  { %v2094_v48 = vpop.eup %2093 }
 0x5c4   :  { %v1481_v54 = vmul.f32 %v2094_v48, %v1475_v50 }
 0x5c6   :  { %v1482_v59 = vpack.c.bf16 %v1481_v54, %v1481_v54 }
 0x5c8   :  { %1559 = vmatmul.bf16.vlgmr.msrb.gmra.mxu0 %v1482_v59 }
 0x645   :  { %v1560_v3 = vpop.f32.mrf.mxu0 }
 0x646   :  { %v1561_v4 = vadd.f32 %v1965_v61, %v1560_v3 }
 0x648   :  { %v1564_v13 = vmax.f32 %v1561_v4, 0.0 }
 0x64a   :  { %v1565_v15 = vpack.c.bf16 %v1564_v13, %v1564_v13 }
 0x64c   :  { %1642 = vmatmul.bf16.vlgmr.msrb.gmra.mxu1 %v1565_v15 }
 0x64d   :  { %v1562_v20 = vpop.f32.mrf.mxu0 }
 0x6c9   :  { %v1643_v29 = vpop.f32.mrf.mxu1 }
 0x6ca   :  { %v1644_v30 = vadd.f32 %v1966_v22, %v1643_v29 }
 0x6cc   :  { %v1647_v32 = vmax.f32 %v1644_v30, 0.0 }
 0x6ce   :  { %1648 = vst [vmem:[#allocation9] sm:$0xff] %v1647_v32 }
 0x6cf   :  { %1659 = dma.vmem_to_hbm [thread:$0]  %s1655_s9, 128, %s1657_s12, [#allocation5]  }
 0x6d1   :  { %v1645_v33 = vpop.f32.mrf.mxu1 }
 0x6d2   :  { %2195 = dma.done.wait [#allocation5], 128  }
 0x6d3   :  { %2196 = vsyncadd [#allocation5], 4294967168 }
 0x6d4   :  { %1664 = vsyncpa [#allocation4], 1 }
 0x6d5   :  { %1665 = vsyncpa [#allocation7], 1 }
 0x6d6   :  { %1666 = vsyncpa [#allocation5], 1 }

</bundles_post_ra>
